<compile_context>
chip_gen: v6e
topology: v6e:2x2x1
jax: 0.10.0
libtpu: 0.0.40
codegen_flags: <defaults>
</compile_context>

<pallas_src>
import functools

import jax
import jax.numpy as jnp
from jax import lax
from jax.experimental import pallas as pl
from jax.experimental.pallas import tpu as pltpu


# ------------------------------------------------------------------ kernel ---
def dnn_kernel(x_ref, noise_ref,
               w1_ref, b1_ref, w2_ref, b2_ref, c_ref,
               w3_ref, b3_ref, w4_ref, b4_ref, gamma_ref, beta_ref,
               out_ref):
    # x arrives as f32 (no wrapper-side convert); cast on the VPU (slack under MXU).
    x = x_ref[...].astype(jnp.bfloat16)                     # (TB, M)

    # ---- encoder: fc1 -> ReLU -> fc2 (bf16 MXU, f32 accumulate) ----
    h1 = jnp.dot(x, w1_ref[...], preferred_element_type=jnp.float32) + b1_ref[...]
    h1 = jnp.maximum(h1, 0.0).astype(jnp.bfloat16)
    z = jnp.dot(h1, w2_ref[...], preferred_element_type=jnp.float32) + b2_ref[...]

    # ---- power normalization (rali=True): sqrt(n)*sqrt(0.5)*z/||z|| ----
    # rsqrt -> EUP; zero-norm rows (only possible for padded batch rows) guarded.
    sumsq = jnp.sum(z * z, axis=1, keepdims=True)
    scale = (float(z.shape[1]) ** 0.5) * (0.5 ** 0.5)
    inv = jnp.where(sumsq > 0.0, lax.rsqrt(sumsq), 0.0)
    z = z * (scale * inv)

    # ---- channel: complex_mul_taps(h, .) folded into (n, n) matrix C ----
    # kept f32 for channel/SNR fidelity (tiny matmul); noise add fused.
    y = jnp.dot(z, c_ref[...], preferred_element_type=jnp.float32) + noise_ref[...]

    # ---- decoder: fc1 -> ReLU -> fc2 ----
    h2 = jnp.dot(y.astype(jnp.bfloat16), w3_ref[...],
                 preferred_element_type=jnp.float32) + b3_ref[...]
    h2 = jnp.maximum(h2, 0.0).astype(jnp.bfloat16)
    o = jnp.dot(h2, w4_ref[...], preferred_element_type=jnp.float32) + b4_ref[...]

    # ---- LayerNorm(M), eps=1e-5, elementwise affine (f32 math, rsqrt on EUP) ----
    mu = jnp.mean(o, axis=1, keepdims=True)
    d = o - mu
    var = jnp.mean(d * d, axis=1, keepdims=True)
    o = d * lax.rsqrt(var + 1e-5)
    out_ref[...] = (o * gamma_ref[...] + beta_ref[...]).astype(out_ref.dtype)


# ----------------------------------------------------------------- wrapper ---
def build_channel_matrix(h, n):
    """Fold complex_mul_taps(h, .) (causal complex tap conv on interleaved
    re/im vectors) into an (n, n) right-multiply matrix:  y = x @ C."""
    L = h.shape[0] // 2
    C = jnp.zeros((n, n), dtype=jnp.float32)
    for k in range(n // 2):
        for j in range(min(L, k + 1)):
            hr, hi = h[2 * j], h[2 * j + 1]
            src = 2 * (k - j)
            C = C.at[src, 2 * k].add(hr)
            C = C.at[src + 1, 2 * k].add(-hi)
            C = C.at[src, 2 * k + 1].add(hi)
            C = C.at[src + 1, 2 * k + 1].add(hr)
    return C


def pick_batch_tile(batch, target=512):
    """Largest batch tile <= target that still yields >= 2 grid steps
    (v7x dual-TC sharding) and is a multiple of 8 (sublane alignment)."""
    tb = min(target, max(8, batch // 2))
    return max(8, (tb // 8) * 8)


@functools.partial(jax.jit, static_argnames=("tb",))
def basic_dnn_forward(x, noise, params, C, *, tb=512):
    B, M = x.shape
    N = noise.shape[1]

    # Pad batch up to a multiple of the batch tile (keeps the (8,128) block
    # constraint satisfied for any B; padded rows are finite and sliced off).
    Bp = pl.cdiv(B, tb) * tb
    if Bp != B:
        x = jnp.pad(x, ((0, Bp - B), (0, 0)))
        noise = jnp.pad(noise, ((0, Bp - B), (0, 0)))

    row = lambda i: (i, 0)        # batch-tiled operands
    const = lambda i: (0, 0)      # VMEM-resident operands

    # Constant-index operands: fetched once -> single buffer (saves VMEM on v7x).
    def resident(a):
        return pl.BlockSpec(a.shape, const, pipeline_mode=pl.Buffered(1))

    in_specs = [
        pl.BlockSpec((tb, M), row),                     # x (f32, cast in-kernel)
        pl.BlockSpec((tb, N), row),                     # noise
        resident(params["w1"]), resident(params["b1"]),
        resident(params["w2"]), resident(params["b2"]),
        resident(C),
        resident(params["w3"]), resident(params["b3"]),
        resident(params["w4"]), resident(params["b4"]),
        resident(params["gamma"]), resident(params["beta"]),
    ]

    out = pl.pallas_call(
        dnn_kernel,
        out_shape=jax.ShapeDtypeStruct((Bp, M), jnp.bfloat16),   # bf16 output stream
        grid=(Bp // tb,),
        in_specs=in_specs,
        out_specs=pl.BlockSpec((tb, M), row),
        compiler_params=pltpu.CompilerParams(
            dimension_semantics=("parallel",),          # shard batch over TCs (v7x)
            vmem_limit_bytes=48 * 1024 * 1024,          # headroom under v7x 64 MiB
        ),
    )(x, noise,
      params["w1"], params["b1"], params["w2"], params["b2"], C,
      params["w3"], params["b3"], params["w4"], params["b4"],
      params["gamma"], params["beta"])
    return out[:B]


# -------------------------------------------------------------------- main ---
if __name__ == "__main__":
    # Small but lane-aligned shapes consistent with the module
    # (original: M=1024, enc=512, n=128, dec=512).
    B, M, H_ENC, N, H_DEC = 256, 256, 128, 128, 128
    SNR = 25.0
    noise_var = 1.0 / (2.0 * 1.0 * (10.0 ** (SNR / 10.0)))

    key = jax.random.PRNGKey(0)
    kx, k1, k2, k3, k4, kh, kn = jax.random.split(key, 7)

    # deterministic parameter init (synthetic; (in, out) layout for y = x @ W + b)
    # matmul weights are pre-cast to bf16 ONCE here, outside the jitted call.
    params = {
        "w1": (jax.random.normal(k1, (M, H_ENC), jnp.float32) * 0.1).astype(jnp.bfloat16),
        "b1": jnp.zeros((1, H_ENC), jnp.float32),
        "w2": (jax.random.normal(k2, (H_ENC, N), jnp.float32) * 0.1).astype(jnp.bfloat16),
        "b2": jnp.zeros((1, N), jnp.float32),
        "w3": (jax.random.normal(k3, (N, H_DEC), jnp.float32) * 0.1).astype(jnp.bfloat16),
        "b3": jnp.zeros((1, H_DEC), jnp.float32),
        "w4": (jax.random.normal(k4, (H_DEC, M), jnp.float32) * 0.1).astype(jnp.bfloat16),
        "b4": jnp.zeros((1, M), jnp.float32),
        "gamma": jnp.ones((1, M), jnp.float32),   # LayerNorm weight
        "beta": jnp.zeros((1, M), jnp.float32),   # LayerNorm bias
    }

    # deterministic single-tap Rayleigh channel h = [h_re, h_im]
    # (stand-in for channel_set_gen(1, 1, True)[0]); C kept f32 for fidelity.
    h = jax.random.normal(kh, (2,), jnp.float32) * jnp.sqrt(0.5)
    C = build_channel_matrix(h, N)

    # deterministic channel noise (replaces torch MultivariateNormal sampling)
    noise = jax.random.normal(kn, (B, N), jnp.float32) * jnp.sqrt(noise_var)

    x = jax.random.normal(kx, (B, M), jnp.float32)

    tb = pick_batch_tile(B, target=512)     # -> 128 here: 2 grid steps
    out = basic_dnn_forward(x, noise, params, C, tb=tb)
    jax.block_until_ready(out)
    assert out.shape == (B, M) and out.dtype == jnp.bfloat16
    assert bool(jnp.all(jnp.isfinite(out.astype(jnp.float32))))
    print("KERNEL_OK")
</pallas_src>

<mosaic_0001>
module attributes {stable_mosaic.version = 11 : i64} {
  func.func @dnn_kernel(%arg0: i32, %arg1: memref<128x256xf32, #tpu.memory_space<vmem>>, %arg2: memref<128x128xf32, #tpu.memory_space<vmem>>, %arg3: memref<256x128xbf16, #tpu.memory_space<vmem>>, %arg4: memref<1x128xf32, #tpu.memory_space<vmem>>, %arg5: memref<128x128xbf16, #tpu.memory_space<vmem>>, %arg6: memref<1x128xf32, #tpu.memory_space<vmem>>, %arg7: memref<128x128xf32, #tpu.memory_space<vmem>>, %arg8: memref<128x128xbf16, #tpu.memory_space<vmem>>, %arg9: memref<1x128xf32, #tpu.memory_space<vmem>>, %arg10: memref<128x256xbf16, #tpu.memory_space<vmem>>, %arg11: memref<1x256xf32, #tpu.memory_space<vmem>>, %arg12: memref<1x256xf32, #tpu.memory_space<vmem>>, %arg13: memref<1x256xf32, #tpu.memory_space<vmem>>, %arg14: memref<128x256xbf16, #tpu.memory_space<vmem>>) attributes {dimension_semantics = [#tpu.dimension_semantics<parallel>], iteration_bounds = array<i64: 2>, scalar_prefetch = 0 : i64, scratch_operands = 0 : i64, tpu.core_type = #tpu.core_type<tc>, window_params = [{transform_indices = @transform_0, window_bounds = array<i64: 128, 256>}, {transform_indices = @transform_1, window_bounds = array<i64: 128, 128>}, {pipeline_mode = #tpu.pipeline_mode<synchronous>, transform_indices = @transform_2, window_bounds = array<i64: 256, 128>}, {pipeline_mode = #tpu.pipeline_mode<synchronous>, transform_indices = @transform_3, window_bounds = array<i64: 1, 128>}, {pipeline_mode = #tpu.pipeline_mode<synchronous>, transform_indices = @transform_4, window_bounds = array<i64: 128, 128>}, {pipeline_mode = #tpu.pipeline_mode<synchronous>, transform_indices = @transform_5, window_bounds = array<i64: 1, 128>}, {pipeline_mode = #tpu.pipeline_mode<synchronous>, transform_indices = @transform_6, window_bounds = array<i64: 128, 128>}, {pipeline_mode = #tpu.pipeline_mode<synchronous>, transform_indices = @transform_7, window_bounds = array<i64: 128, 128>}, {pipeline_mode = #tpu.pipeline_mode<synchronous>, transform_indices = @transform_8, window_bounds = array<i64: 1, 128>}, {pipeline_mode = #tpu.pipeline_mode<synchronous>, transform_indices = @transform_9, window_bounds = array<i64: 128, 256>}, {pipeline_mode = #tpu.pipeline_mode<synchronous>, transform_indices = @transform_10, window_bounds = array<i64: 1, 256>}, {pipeline_mode = #tpu.pipeline_mode<synchronous>, transform_indices = @transform_11, window_bounds = array<i64: 1, 256>}, {pipeline_mode = #tpu.pipeline_mode<synchronous>, transform_indices = @transform_12, window_bounds = array<i64: 1, 256>}, {transform_indices = @transform_13, window_bounds = array<i64: 128, 256>}]} {
    %c0 = arith.constant 0 : index
    %c0_0 = arith.constant 0 : index
    %0 = vector.load %arg1[%c0, %c0_0] : memref<128x256xf32, #tpu.memory_space<vmem>>, vector<128x256xf32>
    %1 = arith.truncf %0 : vector<128x256xf32> to vector<128x256xbf16>
    %c0_1 = arith.constant 0 : index
    %c0_2 = arith.constant 0 : index
    %2 = vector.load %arg3[%c0_1, %c0_2] : memref<256x128xbf16, #tpu.memory_space<vmem>>, vector<256x128xbf16>
    %cst = arith.constant dense<0.000000e+00> : vector<128x128xf32>
    %3 = tpu.matmul %1, %2, %cst {dimension_numbers = #tpu.dot_dimension_numbers<[1], [0], [0], [1], [0, 0, 1, 1], [], []>} : vector<128x256xbf16>, vector<256x128xbf16>, vector<128x128xf32> -> vector<128x128xf32>
    %c0_3 = arith.constant 0 : index
    %c0_4 = arith.constant 0 : index
    %4 = vector.load %arg4[%c0_3, %c0_4] : memref<1x128xf32, #tpu.memory_space<vmem>>, vector<1x128xf32>
    %5 = vector.broadcast %4 : vector<1x128xf32> to vector<128x128xf32>
    %6 = arith.addf %3, %5 : vector<128x128xf32>
    %cst_5 = arith.constant 0.000000e+00 : f32
    %7 = vector.broadcast %cst_5 : f32 to vector<128x128xf32>
    %8 = arith.maximumf %6, %7 : vector<128x128xf32>
    %9 = arith.truncf %8 : vector<128x128xf32> to vector<128x128xbf16>
    %c0_6 = arith.constant 0 : index
    %c0_7 = arith.constant 0 : index
    %10 = vector.load %arg5[%c0_6, %c0_7] : memref<128x128xbf16, #tpu.memory_space<vmem>>, vector<128x128xbf16>
    %cst_8 = arith.constant dense<0.000000e+00> : vector<128x128xf32>
    %11 = tpu.matmul %9, %10, %cst_8 {dimension_numbers = #tpu.dot_dimension_numbers<[1], [0], [0], [1], [0, 0, 1, 1], [], []>} : vector<128x128xbf16>, vector<128x128xbf16>, vector<128x128xf32> -> vector<128x128xf32>
    %c0_9 = arith.constant 0 : index
    %c0_10 = arith.constant 0 : index
    %12 = vector.load %arg6[%c0_9, %c0_10] : memref<1x128xf32, #tpu.memory_space<vmem>>, vector<1x128xf32>
    %13 = vector.broadcast %12 : vector<1x128xf32> to vector<128x128xf32>
    %14 = arith.addf %11, %13 : vector<128x128xf32>
    %15 = arith.mulf %14, %14 : vector<128x128xf32>
    %cst_11 = arith.constant dense<0.000000e+00> : vector<128xf32>
    %16 = vector.multi_reduction <add>, %15, %cst_11 [1] : vector<128x128xf32> to vector<128xf32>
    %17 = vector.shape_cast %16 : vector<128xf32> to vector<128x1xf32>
    %cst_12 = arith.constant 0.000000e+00 : f32
    %18 = vector.broadcast %cst_12 : f32 to vector<128x1xf32>
    %19 = arith.cmpf ogt, %17, %18 : vector<128x1xf32>
    %20 = math.rsqrt %17 : vector<128x1xf32>
    %cst_13 = arith.constant 0.000000e+00 : f32
    %21 = vector.broadcast %cst_13 : f32 to vector<128x1xf32>
    %22 = arith.select %19, %20, %21 : vector<128x1xi1>, vector<128x1xf32>
    %cst_14 = arith.constant 8.000000e+00 : f32
    %23 = vector.broadcast %cst_14 : f32 to vector<128x1xf32>
    %24 = arith.mulf %23, %22 : vector<128x1xf32>
    %25 = vector.broadcast %24 : vector<128x1xf32> to vector<128x128xf32>
    %26 = arith.mulf %14, %25 : vector<128x128xf32>
    %c0_15 = arith.constant 0 : index
    %c0_16 = arith.constant 0 : index
    %27 = vector.load %arg7[%c0_15, %c0_16] : memref<128x128xf32, #tpu.memory_space<vmem>>, vector<128x128xf32>
    %cst_17 = arith.constant dense<0.000000e+00> : vector<128x128xf32>
    %28 = tpu.matmul %26, %27, %cst_17 {dimension_numbers = #tpu.dot_dimension_numbers<[1], [0], [0], [1], [0, 0, 1, 1], [], []>} : vector<128x128xf32>, vector<128x128xf32>, vector<128x128xf32> -> vector<128x128xf32>
    %c0_18 = arith.constant 0 : index
    %c0_19 = arith.constant 0 : index
    %29 = vector.load %arg2[%c0_18, %c0_19] : memref<128x128xf32, #tpu.memory_space<vmem>>, vector<128x128xf32>
    %30 = arith.addf %28, %29 : vector<128x128xf32>
    %31 = arith.truncf %30 : vector<128x128xf32> to vector<128x128xbf16>
    %c0_20 = arith.constant 0 : index
    %c0_21 = arith.constant 0 : index
    %32 = vector.load %arg8[%c0_20, %c0_21] : memref<128x128xbf16, #tpu.memory_space<vmem>>, vector<128x128xbf16>
    %cst_22 = arith.constant dense<0.000000e+00> : vector<128x128xf32>
    %33 = tpu.matmul %31, %32, %cst_22 {dimension_numbers = #tpu.dot_dimension_numbers<[1], [0], [0], [1], [0, 0, 1, 1], [], []>} : vector<128x128xbf16>, vector<128x128xbf16>, vector<128x128xf32> -> vector<128x128xf32>
    %c0_23 = arith.constant 0 : index
    %c0_24 = arith.constant 0 : index
    %34 = vector.load %arg9[%c0_23, %c0_24] : memref<1x128xf32, #tpu.memory_space<vmem>>, vector<1x128xf32>
    %35 = vector.broadcast %34 : vector<1x128xf32> to vector<128x128xf32>
    %36 = arith.addf %33, %35 : vector<128x128xf32>
    %cst_25 = arith.constant 0.000000e+00 : f32
    %37 = vector.broadcast %cst_25 : f32 to vector<128x128xf32>
    %38 = arith.maximumf %36, %37 : vector<128x128xf32>
    %39 = arith.truncf %38 : vector<128x128xf32> to vector<128x128xbf16>
    %c0_26 = arith.constant 0 : index
    %c0_27 = arith.constant 0 : index
    %40 = vector.load %arg10[%c0_26, %c0_27] : memref<128x256xbf16, #tpu.memory_space<vmem>>, vector<128x256xbf16>
    %cst_28 = arith.constant dense<0.000000e+00> : vector<128x256xf32>
    %41 = tpu.matmul %39, %40, %cst_28 {dimension_numbers = #tpu.dot_dimension_numbers<[1], [0], [0], [1], [0, 0, 1, 1], [], []>} : vector<128x128xbf16>, vector<128x256xbf16>, vector<128x256xf32> -> vector<128x256xf32>
    %c0_29 = arith.constant 0 : index
    %c0_30 = arith.constant 0 : index
    %42 = vector.load %arg11[%c0_29, %c0_30] : memref<1x256xf32, #tpu.memory_space<vmem>>, vector<1x256xf32>
    %43 = vector.broadcast %42 : vector<1x256xf32> to vector<128x256xf32>
    %44 = arith.addf %41, %43 : vector<128x256xf32>
    %cst_31 = arith.constant dense<0.000000e+00> : vector<128xf32>
    %45 = vector.multi_reduction <add>, %44, %cst_31 [1] : vector<128x256xf32> to vector<128xf32>
    %46 = vector.shape_cast %45 : vector<128xf32> to vector<128x1xf32>
    %cst_32 = arith.constant 2.560000e+02 : f32
    %47 = vector.broadcast %cst_32 : f32 to vector<128x1xf32>
    %48 = arith.divf %46, %47 : vector<128x1xf32>
    %49 = vector.broadcast %48 : vector<128x1xf32> to vector<128x256xf32>
    %50 = arith.subf %44, %49 : vector<128x256xf32>
    %51 = arith.mulf %50, %50 : vector<128x256xf32>
    %cst_33 = arith.constant dense<0.000000e+00> : vector<128xf32>
    %52 = vector.multi_reduction <add>, %51, %cst_33 [1] : vector<128x256xf32> to vector<128xf32>
    %53 = vector.shape_cast %52 : vector<128xf32> to vector<128x1xf32>
    %cst_34 = arith.constant 2.560000e+02 : f32
    %54 = vector.broadcast %cst_34 : f32 to vector<128x1xf32>
    %55 = arith.divf %53, %54 : vector<128x1xf32>
    %cst_35 = arith.constant 9.99999974E-6 : f32
    %56 = vector.broadcast %cst_35 : f32 to vector<128x1xf32>
    %57 = arith.addf %55, %56 : vector<128x1xf32>
    %58 = math.rsqrt %57 : vector<128x1xf32>
    %59 = vector.broadcast %58 : vector<128x1xf32> to vector<128x256xf32>
    %60 = arith.mulf %50, %59 : vector<128x256xf32>
    %c0_36 = arith.constant 0 : index
    %c0_37 = arith.constant 0 : index
    %61 = vector.load %arg12[%c0_36, %c0_37] : memref<1x256xf32, #tpu.memory_space<vmem>>, vector<1x256xf32>
    %62 = vector.broadcast %61 : vector<1x256xf32> to vector<128x256xf32>
    %63 = arith.mulf %60, %62 : vector<128x256xf32>
    %c0_38 = arith.constant 0 : index
    %c0_39 = arith.constant 0 : index
    %64 = vector.load %arg13[%c0_38, %c0_39] : memref<1x256xf32, #tpu.memory_space<vmem>>, vector<1x256xf32>
    %65 = vector.broadcast %64 : vector<1x256xf32> to vector<128x256xf32>
    %66 = arith.addf %63, %65 : vector<128x256xf32>
    %67 = arith.truncf %66 : vector<128x256xf32> to vector<128x256xbf16>
    %c0_40 = arith.constant 0 : index
    %c0_41 = arith.constant 0 : index
    %68 = vector.load %arg14[%c0_40, %c0_41] : memref<128x256xbf16, #tpu.memory_space<vmem>>, vector<128x256xbf16>
    tpu.vector_store %arg14[%c0_40, %c0_41], %67 {strides = array<i32>} : memref<128x256xbf16, #tpu.memory_space<vmem>>, vector<128x256xbf16>,
    return
  }
  func.func @transform_0(%arg0: i32) -> (i32, i32) {
    %c0_i32 = arith.constant 0 : i32
    %c0_i32_0 = arith.constant 0 : i32
    return %arg0, %c0_i32 : i32, i32
  }
  func.func @transform_1(%arg0: i32) -> (i32, i32) {
    %c0_i32 = arith.constant 0 : i32
    %c0_i32_0 = arith.constant 0 : i32
    return %arg0, %c0_i32 : i32, i32
  }
  func.func @transform_2(%arg0: i32) -> (i32, i32) {
    %c0_i32 = arith.constant 0 : i32
    %c0_i32_0 = arith.constant 0 : i32
    %c0_i32_1 = arith.constant 0 : i32
    return %c0_i32, %c0_i32_0 : i32, i32
  }
  func.func @transform_3(%arg0: i32) -> (i32, i32) {
    %c0_i32 = arith.constant 0 : i32
    %c0_i32_0 = arith.constant 0 : i32
    %c0_i32_1 = arith.constant 0 : i32
    return %c0_i32, %c0_i32_0 : i32, i32
  }
  func.func @transform_4(%arg0: i32) -> (i32, i32) {
    %c0_i32 = arith.constant 0 : i32
    %c0_i32_0 = arith.constant 0 : i32
    %c0_i32_1 = arith.constant 0 : i32
    return %c0_i32, %c0_i32_0 : i32, i32
  }
  func.func @transform_5(%arg0: i32) -> (i32, i32) {
    %c0_i32 = arith.constant 0 : i32
    %c0_i32_0 = arith.constant 0 : i32
    %c0_i32_1 = arith.constant 0 : i32
    return %c0_i32, %c0_i32_0 : i32, i32
  }
  func.func @transform_6(%arg0: i32) -> (i32, i32) {
    %c0_i32 = arith.constant 0 : i32
    %c0_i32_0 = arith.constant 0 : i32
    %c0_i32_1 = arith.constant 0 : i32
    return %c0_i32, %c0_i32_0 : i32, i32
  }
  func.func @transform_7(%arg0: i32) -> (i32, i32) {
    %c0_i32 = arith.constant 0 : i32
    %c0_i32_0 = arith.constant 0 : i32
    %c0_i32_1 = arith.constant 0 : i32
    return %c0_i32, %c0_i32_0 : i32, i32
  }
  func.func @transform_8(%arg0: i32) -> (i32, i32) {
    %c0_i32 = arith.constant 0 : i32
    %c0_i32_0 = arith.constant 0 : i32
    %c0_i32_1 = arith.constant 0 : i32
    return %c0_i32, %c0_i32_0 : i32, i32
  }
  func.func @transform_9(%arg0: i32) -> (i32, i32) {
    %c0_i32 = arith.constant 0 : i32
    %c0_i32_0 = arith.constant 0 : i32
    %c0_i32_1 = arith.constant 0 : i32
    return %c0_i32, %c0_i32_0 : i32, i32
  }
  func.func @transform_10(%arg0: i32) -> (i32, i32) {
    %c0_i32 = arith.constant 0 : i32
    %c0_i32_0 = arith.constant 0 : i32
    %c0_i32_1 = arith.constant 0 : i32
    return %c0_i32, %c0_i32_0 : i32, i32
  }
  func.func @transform_11(%arg0: i32) -> (i32, i32) {
    %c0_i32 = arith.constant 0 : i32
    %c0_i32_0 = arith.constant 0 : i32
    %c0_i32_1 = arith.constant 0 : i32
    return %c0_i32, %c0_i32_0 : i32, i32
  }
  func.func @transform_12(%arg0: i32) -> (i32, i32) {
    %c0_i32 = arith.constant 0 : i32
    %c0_i32_0 = arith.constant 0 : i32
    %c0_i32_1 = arith.constant 0 : i32
    return %c0_i32, %c0_i32_0 : i32, i32
  }
  func.func @transform_13(%arg0: i32) -> (i32, i32) {
    %c0_i32 = arith.constant 0 : i32
    %c0_i32_0 = arith.constant 0 : i32
    return %arg0, %c0_i32 : i32, i32
  }
}

</mosaic_0001>

<bundles_post_ra>
// kernel: basic_dnn_forward.1
= control target key start
LH: loop header
LB: loop body
LE: loop exit
PB: predicated region body
PF: predicated region fallthrough
CT: control target
= control target key end

     0   :  { %s4414_s0 = inlined_call_operand.hbm [shape: f32[256,256], index: 0, kind: input, shape index: {}]   ;;  %s4415_s1 = inlined_call_operand.hbm [shape: f32[256,128], index: 1, kind: input, shape index: {}]   ;;  %s4416_s2 = inlined_call_operand.hbm [shape: bf16[256,128], index: 2, kind: input, shape index: {}]   ;;  %s4417_s3 = inlined_call_operand.vmem [shape: f32[1,128], index: 3, kind: input, shape index: {}]   ;;  %s4418_s4 = inlined_call_operand.hbm [shape: bf16[128,128], index: 4, kind: input, shape index: {}]   ;;  %s4419_s5 = inlined_call_operand.hbm [shape: f32[1,128], index: 5, kind: input, shape index: {}]   ;;  %s4420_s6 = inlined_call_operand.hbm [shape: f32[128,128], index: 6, kind: input, shape index: {}]   ;;  %s4421_s7 = inlined_call_operand.hbm [shape: bf16[128,128], index: 7, kind: input, shape index: {}]   ;;  %s4422_s8 = inlined_call_operand.hbm [shape: f32[1,128], index: 8, kind: input, shape index: {}]   ;;  %s4423_s9 = inlined_call_operand.hbm [shape: bf16[128,256], index: 9, kind: input, shape index: {}]   ;;  %s4424_s10 = inlined_call_operand.vmem [shape: f32[1,256], index: 10, kind: input, shape index: {}]   ;;  %s4425_s11 = inlined_call_operand.vmem [shape: f32[1,256], index: 11, kind: input, shape index: {}]   ;;  %s4426_s12 = inlined_call_operand.vmem [shape: f32[1,256], index: 12, kind: input, shape index: {}]   ;;  %s4427_s13 = inlined_call_operand.hbm [shape: bf16[256,256], index: 13, kind: output, shape index: {}]  }
   0x1   :  { %4440 = sst [smem:[#allocation29_spill]] %s4414_s0 }
   0x2   :  { %4441 = sst [smem:[#allocation30_spill]] %s4416_s2 }
   0x3   :  { %4442 = sst [smem:[#allocation31_spill]] %s4418_s4 }
   0x4   :  { %4443 = sst [smem:[#allocation32_spill]] %s4419_s5 }
   0x5   :  { %4444 = sst [smem:[#allocation33_spill]] %s4420_s6 }
   0x6   :  { %4445 = sst [smem:[#allocation34_spill]] %s4421_s7 }
   0x7   :  { %4446 = sst [smem:[#allocation35_spill]] %s4422_s8 }
   0x8   :  { %4447 = sst [smem:[#allocation36_spill]] %s4423_s9 }
   0x9   :  { %18 = vsyncpa [#allocation3], 0 }
   0xa   :  { %20 = vsyncpa [#allocation3 + $0x1], 0 }
   0xb   :  { %21 = vsyncpa [#allocation6], 0 }
   0xc   :  { %23 = vsyncpa [#allocation6 + $0x1], 0 }
   0xd   :  { %24 = vsyncpa [#allocation9], 0 }
   0xe   :  { %25 = vsyncpa [#allocation12], 0 }
   0xf   :  { %26 = vsyncpa [#allocation15], 0 }
  0x10   :  { %27 = vsyncpa [#allocation4], 0 }
  0x11   :  { %29 = vsyncpa [#allocation4 + $0x1], 0  ;;  %s3483_s25 = smov 0   ;;  %s3485_s26 = smov 0  }
  0x12   :  { %s3487_s27 = smov 0   ;;  %s3489_s28 = smov 0  }
  0x13 LB: > { %4448 = sst [smem:[#allocation25_spill]] %s3388_s27  ;;  %s3394_s29 = smov [#allocation7]   ;;  %s3392_s28 = sphi %s3489_s28, %s4486_s28   ;;  %s3388_s27 = sphi %s3487_s27, %s4488_s27   ;;  %s3384_s26 = sphi %s3485_s26, %s4490_s26   ;;  %s3380_s25 = sphi %s3483_s25, %s4489_s25  }
  0x14   : > { %s361_s30 = sshll.u32 %s3394_s29, 4  ;;  %s3504_s14 = sadd.s32 4294967295, %s3392_s28   ;;  %s362_s30 = int_to_ptr.vmem [resolvable:$true] %s361_s30 }
  0x15   : > { %p2434_p0 = scmp.ge.s32.totalorder %s3392_s28, 1  ;;  %p4430_p1 = scmp.eq.s32.totalorder %s3504_s14, 0 }
  0x16   : > { %p349_p2 = scmp.lt.s32.totalorder %s3392_s28, 3  ;;  %s3395_s16 = smov [#allocation8]  }
  0x17   : > { %s377_s17 = sshll.u32 %s3395_s16, 4  ;;  %s3396_s19 = smov [#allocation11]   ;;  %s3522_s17 = int_to_ptr.vmem [resolvable:$true] %s377_s17 }
  0x18   : > { %p3509_p3 = pnand %p2434_p0, %p349_p2  ;;  %s401_s20 = sshll.u32 %s3396_s19, 4  ;;  %s3524_s20 = int_to_ptr.vmem [resolvable:$true] %s401_s20 }
  0x19   : > { %s3081_s22 = scalar_lea.vmem %s362_s30, 2048  ;;  %p3089_p11 = scmp.lt.s32.totalorder %s362_s30, %s362_s30 }
  0x1a   : > { %p2853_p5 = pneg %p3509_p3  ;;  %p3082_p8 = scmp.ne.s32.totalorder %s362_s30, %s3081_s22 }
  0x1b   : > { %p3090_p12 = scmp.lt.s32.totalorder %s3081_s22, %s3081_s22 }
  0x1c   : > { %p3518_p6 = pnand %p2853_p5, %p4430_p1 }
  0x1d   : > { %p3091_p13 = por %p3090_p12, %p3089_p11 }
  0x1e   : > { %p3528_p7 = pneg %p3518_p6 }
  0x20   : > { %p3084_p9 = pnand %p3082_p8, %p3528_p7 }
  0x22   : > { %p3085_p10 = pneg %p3084_p9 }
  0x24   : > { %p3092_p0 = pnand %p3091_p13, %p3085_p10 }
  0x26   : > { %3095 = shalt.err (!%p3092_p0)
}
  0x27   : > { %s4428_s23 = smov 64   ;;  %s4429_s24 = smov 4  }
  0x28   : > { %s4452_s2 = sld [smem:[#allocation30_spill]]  ;;  %s3107_s19 = scalar_lea.vmem %s3522_s17, 1024 }
  0x29   : > { %p3108_p2 = scmp.ne.s32.totalorder %s3522_s17, %s3107_s19  ;;  %p3115_p9 = scmp.lt.s32.totalorder %s3522_s17, %s3522_s17 }
  0x2a   : > { %p3116_p10 = scmp.lt.s32.totalorder %s3107_s19, %s3107_s19 }
  0x2b   : > { %p3110_p5 = pnand %p3108_p2, %p3528_p7 }
  0x2c   : > { %p3117_p11 = por %p3116_p10, %p3115_p9 }
  0x2d   : > { %p3111_p8 = pneg %p3110_p5 }
  0x2e   : > { %2856 = dma.hbm_to_vmem [thread:$0]  (!%p3518_p6), %s4452_s2, 2048, %s362_s30, [#allocation6], %s4428_s23, %s4428_s23, %s4429_s24  }
  0x2f   : > { %p3118_p12 = pnand %p3117_p11, %p3111_p8 }
  0x31   : > { %3121 = shalt.err (!%p3118_p12)
}
  0x32   : > { %s4453_s4 = sld [smem:[#allocation31_spill]]  ;;  %s3133_s30 = scalar_lea.vmem %s3524_s20, 2048 }
  0x33   : > { %p3134_p13 = scmp.ne.s32.totalorder %s3524_s20, %s3133_s30  ;;  %p3141_p5 = scmp.lt.s32.totalorder %s3524_s20, %s3524_s20 }
  0x34   : > { %p3142_p8 = scmp.lt.s32.totalorder %s3133_s30, %s3133_s30 }
  0x35   : > { %p3136_p0 = pnand %p3134_p13, %p3528_p7 }
  0x36   : > { %p3143_p9 = por %p3142_p8, %p3141_p5 }
  0x37   : > { %p3137_p2 = pneg %p3136_p0 }
  0x38   : > { %2859 = dma.hbm_to_vmem [thread:$0]  (!%p3518_p6), %s4453_s4, 1024, %s3522_s17, [#allocation9], %s4428_s23, %s4428_s23, %s4429_s24  }
  0x39   : > { %p3144_p10 = pnand %p3143_p9, %p3137_p2 }
  0x3b   : > { %3147 = shalt.err (!%p3144_p10)
}
  0x3c   : > { %s4431_s16 = smov 128   ;;  %s4433_s19 = smov 8  }
  0x3d   : > { %s4454_s6 = sld [smem:[#allocation33_spill]]  ;;  %s3401_s29 = smov [#allocation14]  }
  0x3e   : > { %s428_s23 = sshll.u32 %s3401_s29, 4  ;;  %s3402_s30 = smov [#allocation10]   ;;  %s429_s23 = int_to_ptr.vmem [resolvable:$true] %s428_s23 }
  0x3f   : > { %s391_s24 = sshll.u32 %s3402_s30, 4  ;;  %s3159_s2 = scalar_lea.vmem %s429_s23, 16  ;;  %s392_s24 = int_to_ptr.vmem [resolvable:$true] %s391_s24 }
  0x40   : > { %p3160_p11 = scmp.ne.s32.totalorder %s429_s23, %s3159_s2  ;;  %s3166_s4 = scalar_lea.vmem %s429_s23, 32 }
  0x41   : > { %p3167_p0 = scmp.lt.s32.totalorder %s429_s23, %s429_s23  ;;  %p3168_p2 = scmp.lt.s32.totalorder %s3166_s4, %s3159_s2 }
  0x42   : > { %p3162_p12 = pnand %p3160_p11, %p3528_p7 }
  0x43   : > { %2865 = dma.hbm_to_vmem [thread:$0]  (!%p3518_p6), %s4454_s6, 2048, %s3524_s20, [#allocation12], %s4431_s16, %s4431_s16, %s4433_s19  }
  0x44   : > { %p3163_p13 = pneg %p3162_p12  ;;  %p3169_p5 = por %p3168_p2, %p3167_p0 }
  0x46   : > { %p3170_p8 = pnand %p3169_p5, %p3163_p13 }
  0x48   : > { %3173 = shalt.err (!%p3170_p8)
}
  0x49   : > { %s4455_s8 = sld [smem:[#allocation35_spill]]  ;;  %s3185_s22 = scalar_lea.vmem %s392_s24, 16 }
  0x4a   : > { %p3186_p9 = scmp.ne.s32.totalorder %s392_s24, %s3185_s22  ;;  %s3192_s29 = scalar_lea.vmem %s392_s24, 32 }
  0x4b   : > { %p3193_p12 = scmp.lt.s32.totalorder %s392_s24, %s392_s24  ;;  %p3194_p4 = scmp.lt.s32.totalorder %s3192_s29, %s3185_s22 }
  0x4c   : > { %p3188_p10 = pnand %p3186_p9, %p3528_p7 }
  0x4d   : > { %p3195_p1 = por %p3194_p4, %p3193_p12 }
  0x4e   : > { %p3189_p11 = pneg %p3188_p10 }
  0x4f   : > { %2871 = dma.hbm_to_vmem [thread:$0]  (!%p3518_p6), %s4455_s8, 16, %s429_s23, [#allocation15]  }
  0x50   : > { %p3196_p0 = pnand %p3195_p1, %p3189_p11 }
  0x52   : > { %3199 = shalt.err (!%p3196_p0)
}
  0x53   : > { %s4456_s5 = sld [smem:[#allocation32_spill]]  ;;  %s3403_s23 = smov [#allocation13]  }
  0x54   : > { %s414_s30 = sshll.u32 %s3403_s23, 4  ;;  %s3404_s17 = smov [#allocation16]   ;;  %s415_s30 = int_to_ptr.vmem [resolvable:$true] %s414_s30 }
  0x55   : > { %s438_s20 = sshll.u32 %s3404_s17, 4  ;;  %s3211_s16 = scalar_lea.vmem %s415_s30, 1024  ;;  %s439_s20 = int_to_ptr.vmem [resolvable:$true] %s438_s20 }
  0x56   : > { %p3212_p13 = scmp.ne.s32.totalorder %s415_s30, %s3211_s16  ;;  %p3219_p4 = scmp.lt.s32.totalorder %s415_s30, %s415_s30 }
  0x57   : > { %p3220_p1 = scmp.lt.s32.totalorder %s3211_s16, %s3211_s16 }
  0x58   : > { %p3214_p2 = pnand %p3212_p13, %p3528_p7 }
  0x59   : > { %2862 = dma.hbm_to_vmem [thread:$0]  (!%p3518_p6), %s4456_s5, 16, %s392_s24, [#allocation9]  }
  0x5a   : > { %p3215_p5 = pneg %p3214_p2  ;;  %p3221_p8 = por %p3220_p1, %p3219_p4 }
  0x5c   : > { %p3222_p9 = pnand %p3221_p8, %p3215_p5 }
  0x5e   : > { %3225 = shalt.err (!%p3222_p9)
}
  0x5f   : > { %s4457_s22 = smov 4   ;;  %s4458_s29 = smov 64  }
  0x60   : > { %s4459_s7 = sld [smem:[#allocation34_spill]]  ;;  %s3237_s4 = scalar_lea.vmem %s439_s20, 2048 }
  0x61   : > { %p3238_p10 = scmp.ne.s32.totalorder %s439_s20, %s3237_s4  ;;  %p3245_p0 = scmp.lt.s32.totalorder %s439_s20, %s439_s20 }
  0x62   : > { %p3246_p13 = scmp.lt.s32.totalorder %s3237_s4, %s3237_s4 }
  0x63   : > { %p3240_p11 = pnand %p3238_p10, %p3528_p7 }
  0x64   : > { %p3247_p2 = por %p3246_p13, %p3245_p0 }
  0x65   : > { %p3241_p12 = pneg %p3240_p11 }
  0x66   : > { %2868 = dma.hbm_to_vmem [thread:$0]  (!%p3518_p6), %s4459_s7, 1024, %s415_s30, [#allocation12], %s4458_s29, %s4458_s29, %s4457_s22  }
  0x67   : > { %p3248_p5 = pnand %p3247_p2, %p3241_p12 }
  0x69   : > { %3251 = shalt.err (!%p3248_p5)
}
  0x6a   : > { %s4460_s16 = smov 128   ;;  %s4461_s9 = sld [smem:[#allocation36_spill]] }
  0x6b   : > { %s2433_s18 = sadd.s32 4294967294, %s3392_s28   ;;  %s3608_s21 = sadd.s32 1, %s3392_s28  }
  0x6c   : > { %4462 = sst [smem:[#allocation26_spill]] %s3608_s21  ;;  %s42_s30 = sadd.s32 1, %s3388_s27 }
  0x6d   : > { %s39_s22 = ssub.s32 %s3392_s28, %s3608_s21  ;;  %p49_p7 = scmp.ne.s32.totalorder %s3388_s27, %s3384_s26 }
  0x6e   : > { %p40_p4 = scmp.eq.s32.totalorder %s39_s22, 0  ;;  %p50_p1 = scmp.eq.s32.totalorder %s3392_s28, 0 }
  0x6f   : > { %p55_p8 = scmp.ne.s32.totalorder %s3384_s26, %s3380_s25  ;;  %p336_p9 = scmp.eq.s32.totalorder %s3504_s14, 1 }
  0x70   : > { %2874 = dma.hbm_to_vmem [thread:$0]  (!%p3518_p6), %s4461_s9, 2048, %s439_s20, [#allocation15], %s4460_s16, %s4460_s16, %s4433_s19  }
  0x71   : > { %s3620_s29 = scalar_select %p40_p4, %s3388_s27, %s42_s30  }
  0x72   : > { %p51_p10 = por %p50_p1, %p49_p7  ;;  %p4464_p11 = scmp.eq.s32.totalorder %s3504_s14, 0 }
  0x73   : > { %4463 = sst [smem:[#allocation27_spill]] %s3620_s29  ;;  %p3628_p6 = por %p336_p9, %p49_p7 }
  0x74   : > { %p3624_p12 = por %p4464_p11, %p55_p8  ;;  %p342_p0 = scmp.eq.s32.totalorder %s2433_s18, 1 }
  0x75   : > { %s4466_s20 = scalar_select %p3628_p6, 1, 0 }
  0x76   : > { %s4465_s24 = scalar_select %p3624_p12, 1, 0 }
  0x77   : > { %p2893_p13 = scmp.lt.s32.totalorder %s3392_s28, 2  ;;  %s3634_s2 = sand.u32 1, %s3388_s27  }
  0x78   : > { %p3636_p2 = por %p342_p0, %p55_p8  ;;  %s2443_s23 = sshll.u32 %s3634_s2, 8 }
  0x79   : > { %s2535_s17 = sshll.u32 %s3392_s28, 12  ;;  %s4469_s0 = sld [smem:[#allocation29_spill]] }
  0x7a   : > { %s4467_s4 = scalar_select %p3636_p2, 1, 0 }
  0x7b   : > { %s465_s18 = scalar_lea.vmem [#allocation2], %s2443_s23  ;;  %p3647_p5 = pnand %p2893_p13, %p51_p10 }
  0x7c   : > { %4468 = sst [smem:[#allocation28_spill]] %s4467_s4  ;;  %s473_s5 = sshll.u32 %s465_s18, 4  ;;  %s3651_s5 = int_to_ptr.vmem [resolvable:$true] %s473_s5 }
  0x7d   : > { %p3254_p4 = pneg %p3647_p5 }
  0x7f   : > { %s3645_s19 = scalar_lea.hbm %s4469_s0, %s2535_s17  ;;  %s3257_s30 = scalar_lea.hbm %s4469_s0, 8192 }
  0x80   : > { %s3252_s8 = scalar_lea.hbm %s3645_s19, 4096  ;;  %p3258_p9 = scmp.lt.s32.totalorder %s3645_s19, %s4469_s0 }
  0x81   : > { %p3253_p7 = scmp.ne.s32.totalorder %s3645_s19, %s3252_s8  ;;  %p3259_p10 = scmp.lt.s32.totalorder %s3257_s30, %s3252_s8 }
  0x83   : > { %p3255_p1 = pnand %p3254_p4, %p3253_p7  ;;  %p3260_p11 = por %p3259_p10, %p3258_p9 }
  0x85   : > { %p3256_p8 = pneg %p3255_p1 }
  0x87   : > { %p3261_p0 = pnand %p3260_p11, %p3256_p8 }
  0x89   : > { %3264 = shalt.err (!%p3261_p0)
}
  0x8a   : > { %s3265_s7 = scalar_lea.vmem %s3651_s5, 4096  ;;  %s3405_s17 = smov [#allocation2]  }
  0x8b   : > { %p3266_p13 = scmp.ne.s32.totalorder %s3651_s5, %s3265_s7  ;;  %s3270_s23 = sshll.u32 %s3405_s17, 4  ;;  %s3271_s23 = int_to_ptr.vmem [resolvable:$false] %s3270_s23 }
  0x8c   : > { %s3272_s9 = scalar_lea.vmem %s3271_s23, 8192  ;;  %p3273_p2 = scmp.lt.s32.totalorder %s3651_s5, %s3271_s23 }
  0x8d   : > { %p3268_p7 = pnand %p3266_p13, %p3254_p4  ;;  %p3274_p6 = scmp.lt.s32.totalorder %s3272_s9, %s3265_s7 }
  0x8f   : > { %p3269_p1 = pneg %p3268_p7  ;;  %p3275_p12 = por %p3274_p6, %p3273_p2 }
  0x91   : > { %p3276_p9 = pnand %p3275_p12, %p3269_p1 }
  0x93   : > { %3279 = shalt.err (!%p3276_p9)
}
  0x94   : > { %s3406_s8 = smov 256   ;;  %s3407_s30 = smov 16  }
  0x95   : > { %s4471_s22 = scalar_lea.sflag [#allocation3], %s3634_s2  ;;  %s483_s18 = sand.u32 1, %s3392_s28  }
  0x96   : > { %2878 = dma.hbm_to_vmem [thread:$0]  (!%p3647_p5), %s3645_s19, 4096, %s3651_s5, %s4471_s22, %s3406_s8, %s3406_s8, %s3407_s30  }
  0x97   : > { %s2447_s17 = sshll.u32 %s3634_s2, 7  ;;  %s2536_s23 = sshll.u32 %s3392_s28, 11 }
  0x98   : > { %s487_s7 = scalar_lea.vmem [#allocation5], %s2447_s17  ;;  %s3686_s27 = scalar_lea.hbm %s4415_s1, %s2536_s23 }
  0x99   : > { %s494_s9 = sshll.u32 %s487_s7, 4  ;;  %s484_s21 = scalar_lea.sflag [#allocation6], %s483_s18  ;;  %s3688_s9 = int_to_ptr.vmem [resolvable:$true] %s494_s9 }
  0x9a   : > { %s3280_s4 = scalar_lea.hbm %s3686_s27, 2048  ;;  %s3285_s2 = scalar_lea.hbm %s4415_s1, 4096 }
  0x9b   : > { %p3281_p12 = scmp.ne.s32.totalorder %s3686_s27, %s3280_s4  ;;  %p3286_p8 = scmp.lt.s32.totalorder %s3686_s27, %s4415_s1 }
  0x9c   : > { %p3287_p10 = scmp.lt.s32.totalorder %s3285_s2, %s3280_s4 }
  0x9d   : > { %p3283_p6 = pnand %p3281_p12, %p3254_p4 }
  0x9e   : > { %p3288_p11 = por %p3287_p10, %p3286_p8 }
  0x9f   : > { %p3284_p2 = pneg %p3283_p6 }
  0xa1   : > { %p3289_p0 = pnand %p3288_p11, %p3284_p2 }
  0xa3   : > { %3292 = shalt.err (!%p3289_p0)
}
  0xa4   : > { %s3293_s29 = scalar_lea.vmem %s3688_s9, 2048  ;;  %s3408_s30 = smov [#allocation5]  }
  0xa5   : > { %p3294_p13 = scmp.ne.s32.totalorder %s3688_s9, %s3293_s29  ;;  %s3298_s22 = sshll.u32 %s3408_s30, 4  ;;  %s3299_s22 = int_to_ptr.vmem [resolvable:$false] %s3298_s22 }
  0xa6   : > { %s3300_s18 = scalar_lea.vmem %s3299_s22, 4096  ;;  %p3301_p9 = scmp.lt.s32.totalorder %s3688_s9, %s3299_s22 }
  0xa7   : > { %p3296_p7 = pnand %p3294_p13, %p3254_p4  ;;  %p3302_p12 = scmp.lt.s32.totalorder %s3300_s18, %s3293_s29 }
  0xa9   : > { %p3297_p1 = pneg %p3296_p7  ;;  %p3303_p6 = por %p3302_p12, %p3301_p9 }
  0xab   : > { %p3304_p8 = pnand %p3303_p6, %p3297_p1 }
  0xad   : > { %3307 = shalt.err (!%p3304_p8)
}
  0xae   : > { %s4472_s4 = smov 8   ;;  %506 = sbr.rel (%p3509_p3) target bundleno = 1796 (0x704), region = 72 }
  0xaf   : > { %2881 = dma.hbm_to_vmem [thread:$0]  (!%p3647_p5), %s3686_s27, 2048, %s3688_s9, %s484_s21, %s4460_s16, %s4460_s16, %s4472_s4  }
  0xb0   : > { %s3718_s17 = sand.u32 (!%p3509_p3), 1, %s3384_s26   ;;  %p4473_p4 = scmp.ne.s32.totalorder (!%p3509_p3), %s4465_s24, 0 }
  0xb1   : > { %s2451_s23 = sshll.u32 (!%p3509_p3), %s3718_s17, 8  ;;  %s509_s7 = scalar_lea.sflag (!%p3509_p3), [#allocation3], %s3718_s17 }
  0xb2   : > { %s3722_s5 = scalar_lea.vmem (!%p3509_p3), [#allocation2], %s2451_s23 }
  0xb3   : > { %3351 = dma.done.wait (%p4473_p4), %s509_s7, 4096  }
  0xb4   : > { %3353 = vsyncadd (%p4473_p4), %s509_s7, 4294963200  ;;  %s517_s6 = sand.u32 1, %s3504_s14   ;;  %s2452_s27 = sshll.u32 %s3718_s17, 7 }
  0xb5   : > { %s518_s15 = scalar_lea.sflag [#allocation6], %s517_s6  ;;  %s3732_s16 = scalar_lea.vmem [#allocation5], %s2452_s27 }
  0xb6   : > { %3355 = dma.done.wait (%p4473_p4), %s518_s15, 2048  }
  0xb7   : > { %3357 = vsyncadd (%p4473_p4), %s518_s15, 4294965248  ;;  %p4474_p3 = scmp.eq.s32.totalorder %s3504_s14, 0 }
  0xb9   : > { %3359 = dma.done.wait (%p4474_p3), [#allocation6], 2048   ;;  %p4475_p5 = pmov %p4474_p3 }
  0xba   : > { %p4476_p2 = pmov %p4474_p3 }
  0xbb   : > { %3361 = vsyncadd (%p4475_p5), [#allocation6], 4294965248 }
  0xbc   : > { %3363 = dma.done.wait (%p4476_p2), [#allocation9], 1040   ;;  %p4477_p10 = pmov %p4476_p2 }
  0xbd   : > { %p4478_p11 = pmov %p4476_p2 }
  0xbe   : > { %3365 = vsyncadd (%p4477_p10), [#allocation9], 4294966256 }
  0xbf   : > { %3367 = dma.done.wait (%p4478_p11), [#allocation12], 3072   ;;  %p4479_p0 = pmov %p4476_p2 }
  0xc1   : > { %3369 = vsyncadd (%p4479_p0), [#allocation12], 4294964224  ;;  %p4480_p13 = pmov %p4479_p0 }
  0xc2   : > { %p4481_p7 = pmov %p4479_p0 }
  0xc3   : > { %3371 = dma.done.wait (%p4480_p13), [#allocation15], 2064  }
  0xc4   : > { %3373 = vsyncadd (%p4481_p7), [#allocation15], 4294965232  ;;  %v2950_v0 = vld [vmem:[#allocation7 + $0x78] sm:$0xff]   ;;  %v2952_v2 = vld [vmem:[#allocation7 + $0x70] sm:$0xff]   ;;  %s4260_s30 = scalar_lea.vmem [#allocation17], %s2452_s27  ;;  %s2554_s22 = sshll.u32 %s3504_s14, 11 }
  0xc5   : > { %v2951_v1 = vld [vmem:[#allocation7 + $0x38] sm:$0xff]   ;;  %2555 = vmatprep.subr.bf16.mxu0 %v2950_v0  ;;  %v2953_v3 = vld [vmem:[#allocation7 + $0x30] sm:$0xff]   ;;  %v2954_v4 = vld [vmem:[#allocation7 + $0x68] sm:$0xff]   ;;  %s2271_s18 = sshll.u32 %s4260_s30, 4  ;;  %s4368_s7 = scalar_lea.hbm %s4427_s13, %s2554_s22  ;;  %s4370_s18 = int_to_ptr.vmem [resolvable:$true] %s2271_s18 }
  0xc6   : > { %2556 = vmatpush3.bf16.msra.mxu0 %v2951_v1  ;;  %v2955_v5 = vld [vmem:[#allocation7 + $0x28] sm:$0xff]   ;;  %v2956_v6 = vld [vmem:[#allocation7 + $0x60] sm:$0xff]   ;;  %v2958_v8 = vld [vmem:[#allocation7 + $0x58] sm:$0xff]   ;;  %s3308_s14 = scalar_lea.vmem %s4370_s18, 2048  ;;  %p4482_p9 = scmp.ne.s32.totalorder %s4466_s20, 0 }
  0xc7   : > { %2557 = vmatprep.subr.bf16.mxu0 %v2952_v2  ;;  %v2957_v7 = vld [vmem:[#allocation7 + $0x20] sm:$0xff]   ;;  %v2959_v9 = vld [vmem:[#allocation7 + $0x18] sm:$0xff]   ;;  %v2960_v10 = vld [vmem:[#allocation7 + $0x50] sm:$0xff]   ;;  %p3309_p1 = scmp.ne.s32.totalorder %s4370_s18, %s3308_s14  ;;  %s3410_s6 = smov [#allocation17]  }
  0xc8   : > { %v602_v11 = vld [vmem:[%s3722_s5 + $0x8] sm:$0xff]  ;;  %v604_v12 = vld [vmem:[%s3722_s5 + $0x18] sm:$0xff]  ;;  %v2961_v14 = vld [vmem:[#allocation7 + $0x10] sm:$0xff]   ;;  %s3312_s27 = sshll.u32 %s3410_s6, 4  ;;  %s3313_s27 = int_to_ptr.vmem [resolvable:$false] %s3312_s27 }
  0xc9   : > { %v634_v13 = vpack.c.bf16 %v604_v12, %v602_v11  ;;  %v2962_v15 = vld [vmem:[#allocation7 + $0x48] sm:$0xff]   ;;  %v2964_v17 = vld [vmem:[#allocation7 + $0x40] sm:$0xff]   ;;  %v603_v20 = vld [vmem:[%s3722_s5 + $0x10] sm:$0xff]  ;;  %p3310_p12 = pnand %p3309_p1, %p4482_p9  ;;  %s3314_s15 = scalar_lea.vmem %s3313_s27, 4096 }
  0xca   : > { %2558 = vmatpush3.bf16.msra.mxu0 %v2953_v3  ;;  %v2963_v16 = vld [vmem:[#allocation7 + $0x8] sm:$0xff]   ;;  %v2965_v18 = vld [vmem:[#allocation7] sm:$0xff]   ;;  %v608_v22 = vld [vmem:[%s3722_s5 + $0x38] sm:$0xff]  ;;  %p3315_p8 = scmp.lt.s32.totalorder %s4370_s18, %s3313_s27  ;;  %p3316_p4 = scmp.lt.s32.totalorder %s3314_s15, %s3308_s14 }
  0xcb   : > { %2559 = vmatprep.subr.bf16.mxu0 %v2954_v4  ;;  %816 = vmatprep.mubr.bf16.mxu0 %v634_v13  ;;  %v601_v19 = vld [vmem:[%s3722_s5] sm:$0xff]  ;;  %v606_v21 = vld [vmem:[%s3722_s5 + $0x28] sm:$0xff]  ;;  %v2966_v23 = vld [vmem:[#allocation8 + $0x38] sm:$0xff]   ;;  %p3311_p6 = pneg %p3310_p12 }
  0xcc   : > { %v2967_v24 = vld [vmem:[#allocation8 + $0x30] sm:$0xff]   ;;  %2683 = vmatprep.subr.bf16.mxu1 %v2966_v23  ;;  %v2968_v25 = vld [vmem:[#allocation8 + $0x28] sm:$0xff]   ;;  %v633_v26 = vpack.c.bf16 %v603_v20, %v601_v19  ;;  %v636_v27 = vpack.c.bf16 %v608_v22, %v606_v21  ;;  %v605_v28 = vld [vmem:[%s3722_s5 + $0x20] sm:$0xff]  ;;  %p3317_p3 = por %p3316_p4, %p3315_p8 }
  0xcd   : > { %2684 = vmatpush3.bf16.msra.mxu1 %v2966_v23  ;;  %v607_v29 = vld [vmem:[%s3722_s5 + $0x30] sm:$0xff]  ;;  %v610_v30 = vld [vmem:[%s3722_s5 + $0x48] sm:$0xff]  ;;  %v612_v31 = vld [vmem:[%s3722_s5 + $0x58] sm:$0xff] }
  0xce   : > { %2560 = vmatpush3.bf16.msra.mxu0 %v2955_v5  ;;  %2685 = vmatprep.subr.bf16.mxu1 %v2967_v24  ;;  %v635_v32 = vpack.c.bf16 %v607_v29, %v605_v28  ;;  %v638_v33 = vpack.c.bf16 %v612_v31, %v610_v30  ;;  %v609_v34 = vld [vmem:[%s3722_s5 + $0x40] sm:$0xff]  ;;  %v611_v35 = vld [vmem:[%s3722_s5 + $0x50] sm:$0xff]  ;;  %v614_v36 = vld [vmem:[%s3722_s5 + $0x68] sm:$0xff]  ;;  %p3318_p5 = pnand %p3317_p3, %p3311_p6 }
  0xcf   : > { %2561 = vmatprep.subr.bf16.mxu0 %v2956_v6  ;;  %v616_v37 = vld [vmem:[%s3722_s5 + $0x78] sm:$0xff]  ;;  %v637_v38 = vpack.c.bf16 %v611_v35, %v609_v34  ;;  %v613_v40 = vld [vmem:[%s3722_s5 + $0x60] sm:$0xff]  ;;  %v615_v41 = vld [vmem:[%s3722_s5 + $0x70] sm:$0xff] }
  0xd0   : > { %v640_v39 = vpack.c.bf16 %v616_v37, %v614_v36  ;;  %v618_v42 = vld [vmem:[%s3722_s5 + $0x88] sm:$0xff]  ;;  %v620_v43 = vld [vmem:[%s3722_s5 + $0x98] sm:$0xff]  ;;  %v639_v44 = vpack.c.bf16 %v615_v41, %v613_v40  ;;  %v617_v46 = vld [vmem:[%s3722_s5 + $0x80] sm:$0xff] }
  0xd1   : > { %2686 = vmatpush3.bf16.msra.mxu1 %v2967_v24  ;;  %v642_v45 = vpack.c.bf16 %v620_v43, %v618_v42  ;;  %v619_v47 = vld [vmem:[%s3722_s5 + $0x90] sm:$0xff]  ;;  %v622_v48 = vld [vmem:[%s3722_s5 + $0xa8] sm:$0xff]  ;;  %v624_v49 = vld [vmem:[%s3722_s5 + $0xb8] sm:$0xff] }
  0xd2   : > { %2562 = vmatpush3.bf16.msra.mxu0 %v2957_v7  ;;  %2687 = vmatprep.subr.bf16.mxu1 %v2968_v25  ;;  %v641_v50 = vpack.c.bf16 %v619_v47, %v617_v46  ;;  %v644_v51 = vpack.c.bf16 %v624_v49, %v622_v48  ;;  %v621_v52 = vld [vmem:[%s3722_s5 + $0xa0] sm:$0xff]  ;;  %v623_v53 = vld [vmem:[%s3722_s5 + $0xb0] sm:$0xff]  ;;  %v626_v54 = vld [vmem:[%s3722_s5 + $0xc8] sm:$0xff] }
  0xd3   : > { %2563 = vmatprep.subr.bf16.mxu0 %v2958_v8  ;;  %v628_v55 = vld [vmem:[%s3722_s5 + $0xd8] sm:$0xff]  ;;  %v643_v56 = vpack.c.bf16 %v623_v53, %v621_v52  ;;  %v625_v58 = vld [vmem:[%s3722_s5 + $0xc0] sm:$0xff]  ;;  %v627_v59 = vld [vmem:[%s3722_s5 + $0xd0] sm:$0xff] }
  0xd4   : > { %v646_v57 = vpack.c.bf16 %v628_v55, %v626_v54  ;;  %v630_v60 = vld [vmem:[%s3722_s5 + $0xe8] sm:$0xff]  ;;  %v632_v61 = vld [vmem:[%s3722_s5 + $0xf8] sm:$0xff]  ;;  %v645_v62 = vpack.c.bf16 %v627_v59, %v625_v58  ;;  %v629_v0 = vld [vmem:[%s3722_s5 + $0xe0] sm:$0xff] }
  0xd5   : > { %2688 = vmatpush3.bf16.msra.mxu1 %v2968_v25  ;;  %v648_v63 = vpack.c.bf16 %v632_v61, %v630_v60  ;;  %v631_v1 = vld [vmem:[%s3722_s5 + $0xf0] sm:$0xff]  ;;  %v2969_v3 = vld [vmem:[#allocation8 + $0x20] sm:$0xff]   ;;  %v2970_v4 = vld [vmem:[#allocation8 + $0x18] sm:$0xff]   ;;  %s2257_s5 = scalar_lea.sflag [#allocation4], %s3718_s17 }
  0xd6   : > { %2564 = vmatpush3.bf16.msra.mxu0 %v2959_v9  ;;  %v647_v2 = vpack.c.bf16 %v631_v1, %v629_v0  ;;  %2689 = vmatprep.subr.bf16.mxu1 %v2969_v3  ;;  %v2971_v5 = vld [vmem:[#allocation8 + $0x10] sm:$0xff]   ;;  %v2972_v6 = vld [vmem:[#allocation8 + $0x8] sm:$0xff]   ;;  %v2973_v7 = vld [vmem:[#allocation8] sm:$0xff]  }
  0xd7   : > { %2565 = vmatprep.subr.bf16.mxu0 %v2960_v10  ;;  %v3789_v12 = vld [vmem:[%s4417_s3] ss:$0 sm:$0xff] }
  0xd9   : > { %2690 = vmatpush3.bf16.msra.mxu1 %v2969_v3 }
  0xda   : > { %2566 = vmatpush3.bf16.msra.mxu0 %v2961_v14  ;;  %2691 = vmatprep.subr.bf16.mxu1 %v2970_v4 }
  0xdb   : > { %2567 = vmatprep.subr.bf16.mxu0 %v2962_v15 }
  0xdd   : > { %2692 = vmatpush3.bf16.msra.mxu1 %v2970_v4 }
  0xde   : > { %2568 = vmatpush3.bf16.msra.mxu0 %v2963_v16  ;;  %2693 = vmatprep.subr.bf16.mxu1 %v2971_v5 }
  0xdf   : > { %2569 = vmatprep.subr.bf16.mxu0 %v2964_v17 }
  0xe1   : > { %2694 = vmatpush3.bf16.msra.mxu1 %v2971_v5 }
  0xe2   : > { %2570 = vmatpush3.bf16.msra.mxu0 %v2965_v18  ;;  %2695 = vmatprep.subr.bf16.mxu1 %v2972_v6 }
  0xe5   : > { %817 = vmatmul.mubr.bf16.vlgmr.msra.gmra.mxu0 %v633_v26  ;;  %2696 = vmatpush3.bf16.msra.mxu1 %v2972_v6 }
  0xe6   : > { %824 = vmatprep.mubr.bf16.mxu0 %v636_v27  ;;  %2697 = vmatprep.subr.bf16.mxu1 %v2973_v7 }
  0xe9   : > { %2698 = vmatpush3.bf16.msra.mxu1 %v2973_v7 }
  0xed   : > { %825 = vmatmul.mubr.bf16.gmra.mxu0 %v635_v32 }
  0xee   : > { %832 = vmatprep.mubr.bf16.mxu0 %v638_v33 }
  0xf5   : > { %833 = vmatmul.mubr.bf16.gmra.mxu0 %v637_v38 }
  0xf6   : > { %840 = vmatprep.mubr.bf16.mxu0 %v640_v39 }
  0xfd   : > { %841 = vmatmul.mubr.bf16.gmra.mxu0 %v639_v44 }
  0xfe   : > { %848 = vmatprep.mubr.bf16.mxu0 %v642_v45 }
 0x105   : > { %849 = vmatmul.mubr.bf16.gmra.mxu0 %v641_v50 }
 0x106   : > { %856 = vmatprep.mubr.bf16.mxu0 %v644_v51 }
 0x10d   : > { %857 = vmatmul.mubr.bf16.gmra.mxu0 %v643_v56 }
 0x10e   : > { %864 = vmatprep.mubr.bf16.mxu0 %v646_v57 }
 0x115   : > { %865 = vmatmul.mubr.bf16.gmra.mxu0 %v645_v62 }
 0x116   : > { %872 = vmatprep.mubr.bf16.mxu0 %v648_v63 }
 0x11d   : > { %873 = vmatmul.mubr.bf16.gmra.mxu0 %v647_v2 }
 0x1a5   : > { %v2571_v8 = vpop.f32.mrf.mxu0 }
 0x1a7   : > { %v2572_v9 = vpop.f32.mrf.mxu0 }
 0x1a8   : > { %v2573_v10 = vadd.f32 %v2572_v9, %v2571_v8 }
 0x1a9   : > { %v2574_v11 = vpop.f32.mrf.mxu0 }
 0x1aa   : > { %v819_v15 = vadd.f32 %v2573_v10, %v3789_v12 }
 0x1ab   : > { %v2575_v13 = vpop.f32.mrf.mxu0 }
 0x1ac   : > { %v2576_v14 = vadd.f32 %v2575_v13, %v2574_v11  ;;  %v881_v20 = vmax.f32 %v819_v15, 0.0 }
 0x1ad   : > { %v2577_v16 = vpop.f32.mrf.mxu0 }
 0x1ae   : > { %v822_v17 = vadd.f32 %v2576_v14, %v3789_v12 }
 0x1af   : > { %v2578_v18 = vpop.f32.mrf.mxu0 }
 0x1b0   : > { %v2579_v19 = vadd.f32 %v2578_v18, %v2577_v16  ;;  %v882_v21 = vmax.f32 %v822_v17, 0.0 }
 0x1b1   : > { %v2580_v22 = vpop.f32.mrf.mxu0 }
 0x1b2   : > { %v897_v23 = vpack.c.bf16 %v882_v21, %v881_v20  ;;  %v827_v25 = vadd.f32 %v2579_v19, %v3789_v12 }
 0x1b3   : > { %v2581_v24 = vpop.f32.mrf.mxu0 }
 0x1b4   : > { %v2582_v26 = vadd.f32 %v2581_v24, %v2580_v22  ;;  %2699 = vmatprep.mubr.bf16.mxu1 %v897_v23  ;;  %v883_v30 = vmax.f32 %v827_v25, 0.0 }
 0x1b5   : > { %v2583_v27 = vpop.f32.mrf.mxu0 }
 0x1b6   : > { %v830_v28 = vadd.f32 %v2582_v26, %v3789_v12 }
 0x1b7   : > { %v2584_v29 = vpop.f32.mrf.mxu0 }
 0x1b8   : > { %v884_v31 = vmax.f32 %v830_v28, 0.0  ;;  %v2585_v32 = vadd.f32 %v2584_v29, %v2583_v27 }
 0x1b9   : > { %v2586_v33 = vpop.f32.mrf.mxu0 }
 0x1ba   : > { %v898_v34 = vpack.c.bf16 %v884_v31, %v883_v30  ;;  %v835_v36 = vadd.f32 %v2585_v32, %v3789_v12 }
 0x1bb   : > { %v2587_v35 = vpop.f32.mrf.mxu0 }
 0x1bc   : > { %v2588_v37 = vadd.f32 %v2587_v35, %v2586_v33  ;;  %2700 = vmatmul.mubr.bf16.vlgmr.msra.gmra.mxu1 %v898_v34  ;;  %v885_v41 = vmax.f32 %v835_v36, 0.0  ;;  %v1216_v34 = vld [vmem:[#allocation11 + $0x78] sm:$0xff]  ;;  %v1215_v35 = vld [vmem:[#allocation11 + $0x70] sm:$0xff]  ;;  %v1214_v36 = vld [vmem:[#allocation11 + $0x68] sm:$0xff] }
 0x1bd   : > { %v2589_v38 = vpop.f32.mrf.mxu0  ;;  %2715 = vmatprep.subr.mxu1 %v1216_v34 }
 0x1be   : > { %v838_v39 = vadd.f32 %v2588_v37, %v3789_v12  ;;  %2716 = vmatpush3.msra.mxu1 %v1216_v34  ;;  %v1213_v37 = vld [vmem:[#allocation11 + $0x60] sm:$0xff] }
 0x1bf   : > { %v2590_v40 = vpop.f32.mrf.mxu0  ;;  %2717 = vmatprep.subr.mxu1 %v1215_v35 }
 0x1c0   : > { %v886_v42 = vmax.f32 %v838_v39, 0.0  ;;  %v2591_v43 = vadd.f32 %v2590_v40, %v2589_v38  ;;  %2718 = vmatpush3.msra.mxu1 %v1215_v35  ;;  %v3807_v38 = vld [vmem:[#allocation10] ss:$0 sm:$0xff] }
 0x1c1   : > { %v2592_v44 = vpop.f32.mrf.mxu0  ;;  %2719 = vmatprep.subr.mxu1 %v1214_v36  ;;  %v2974_v35 = vld [vmem:[#allocation13 + $0x38] sm:$0xff]  }
 0x1c2   : > { %v899_v45 = vpack.c.bf16 %v886_v42, %v885_v41  ;;  %v843_v47 = vadd.f32 %v2591_v43, %v3789_v12  ;;  %2720 = vmatpush3.msra.mxu1 %v1214_v36  ;;  %v2975_v36 = vld [vmem:[#allocation13 + $0x30] sm:$0xff]   ;;  %2771 = vmatprep.subr.bf16.mxu0 %v2974_v35 }
 0x1c3   : > { %v2593_v46 = vpop.f32.mrf.mxu0  ;;  %2721 = vmatprep.subr.mxu1 %v1213_v37  ;;  %2772 = vmatpush3.bf16.msra.mxu0 %v2974_v35 }
 0x1c4   : > { %v2594_v48 = vadd.f32 %v2593_v46, %v2592_v44  ;;  %2703 = vmatprep.mubr.bf16.mxu1 %v899_v45  ;;  %v887_v52 = vmax.f32 %v843_v47, 0.0  ;;  %2722 = vmatpush3.msra.mxu1 %v1213_v37  ;;  %v2976_v37 = vld [vmem:[#allocation13 + $0x28] sm:$0xff]  }
 0x1c5   : > { %v2595_v49 = vpop.f32.mrf.mxu0  ;;  %2773 = vmatprep.subr.bf16.mxu0 %v2975_v36 }
 0x1c6   : > { %v846_v50 = vadd.f32 %v2594_v48, %v3789_v12 }
 0x1c7   : > { %v2596_v51 = vpop.f32.mrf.mxu0  ;;  %2774 = vmatpush3.bf16.msra.mxu0 %v2975_v36 }
 0x1c8   : > { %v888_v53 = vmax.f32 %v846_v50, 0.0  ;;  %v2597_v54 = vadd.f32 %v2596_v51, %v2595_v49  ;;  %v1212_v50 = vld [vmem:[#allocation11 + $0x58] sm:$0xff]  ;;  %2775 = vmatprep.subr.bf16.mxu0 %v2976_v37 }
 0x1c9   : > { %v2598_v55 = vpop.f32.mrf.mxu0  ;;  %2723 = vmatprep.subr.mxu1 %v1212_v50 }
 0x1ca   : > { %v900_v56 = vpack.c.bf16 %v888_v53, %v887_v52  ;;  %v851_v58 = vadd.f32 %v2597_v54, %v3789_v12  ;;  %2724 = vmatpush3.msra.mxu1 %v1212_v50  ;;  %v1211_v52 = vld [vmem:[#allocation11 + $0x50] sm:$0xff] }
 0x1cb   : > { %v2599_v57 = vpop.f32.mrf.mxu0  ;;  %2725 = vmatprep.subr.mxu1 %v1211_v52  ;;  %2776 = vmatpush3.bf16.msra.mxu0 %v2976_v37 }
 0x1cc   : > { %v2600_v59 = vadd.f32 %v2599_v57, %v2598_v55  ;;  %2704 = vmatmul.mubr.bf16.gmra.mxu1 %v900_v56  ;;  %v889_v63 = vmax.f32 %v851_v58, 0.0  ;;  %v1210_v55 = vld [vmem:[#allocation11 + $0x48] sm:$0xff] }
 0x1cd   : > { %v2601_v60 = vpop.f32.mrf.mxu0  ;;  %2726 = vmatpush3.msra.mxu1 %v1211_v52 }
 0x1ce   : > { %v854_v61 = vadd.f32 %v2600_v59, %v3789_v12  ;;  %2727 = vmatprep.subr.mxu1 %v1210_v55  ;;  %v1209_v59 = vld [vmem:[#allocation11 + $0x40] sm:$0xff] }
 0x1cf   : > { %v2602_v62 = vpop.f32.mrf.mxu0  ;;  %2728 = vmatpush3.msra.mxu1 %v1210_v55 }
 0x1d0   : > { %v890_v0 = vmax.f32 %v854_v61, 0.0  ;;  %v2603_v1 = vadd.f32 %v2602_v62, %v2601_v60  ;;  %2729 = vmatprep.subr.mxu1 %v1209_v59  ;;  %v1208_v62 = vld [vmem:[#allocation11 + $0x38] sm:$0xff] }
 0x1d1   : > { %v2604_v2 = vpop.f32.mrf.mxu0  ;;  %2730 = vmatpush3.msra.mxu1 %v1209_v59 }
 0x1d2   : > { %v901_v3 = vpack.c.bf16 %v890_v0, %v889_v63  ;;  %v859_v5 = vadd.f32 %v2603_v1, %v3789_v12  ;;  %2731 = vmatprep.subr.mxu1 %v1208_v62 }
 0x1d3   : > { %v2605_v4 = vpop.f32.mrf.mxu0  ;;  %2732 = vmatpush3.msra.mxu1 %v1208_v62 }
 0x1d4   : > { %v2606_v6 = vadd.f32 %v2605_v4, %v2604_v2  ;;  %2707 = vmatprep.mubr.bf16.mxu1 %v901_v3  ;;  %v891_v10 = vmax.f32 %v859_v5, 0.0  ;;  %v1207_v2 = vld [vmem:[#allocation11 + $0x30] sm:$0xff]  ;;  %v1206_v3 = vld [vmem:[#allocation11 + $0x28] sm:$0xff]  ;;  %v1205_v5 = vld [vmem:[#allocation11 + $0x20] sm:$0xff] }
 0x1d5   : > { %v2607_v7 = vpop.f32.mrf.mxu0  ;;  %2733 = vmatprep.subr.mxu1 %v1207_v2 }
 0x1d6   : > { %v862_v8 = vadd.f32 %v2606_v6, %v3789_v12  ;;  %2734 = vmatpush3.msra.mxu1 %v1207_v2  ;;  %v1204_v6 = vld [vmem:[#allocation11 + $0x18] sm:$0xff] }
 0x1d7   : > { %v2608_v9 = vpop.f32.mrf.mxu0  ;;  %2735 = vmatprep.subr.mxu1 %v1206_v3 }
 0x1d8   : > { %v892_v11 = vmax.f32 %v862_v8, 0.0  ;;  %v2609_v13 = vadd.f32 %v2608_v9, %v2607_v7  ;;  %2736 = vmatpush3.msra.mxu1 %v1206_v3  ;;  %v1203_v8 = vld [vmem:[#allocation11 + $0x10] sm:$0xff] }
 0x1d9   : > { %v2610_v14 = vpop.f32.mrf.mxu0  ;;  %2737 = vmatprep.subr.mxu1 %v1205_v5 }
 0x1da   : > { %v902_v15 = vpack.c.bf16 %v892_v11, %v891_v10  ;;  %v867_v17 = vadd.f32 %v2609_v13, %v3789_v12  ;;  %2738 = vmatpush3.msra.mxu1 %v1205_v5  ;;  %v1202_v11 = vld [vmem:[#allocation11 + $0x8] sm:$0xff] }
 0x1db   : > { %v2611_v16 = vpop.f32.mrf.mxu0  ;;  %2739 = vmatprep.subr.mxu1 %v1204_v6 }
 0x1dc   : > { %v2612_v18 = vadd.f32 %v2611_v16, %v2610_v14  ;;  %2708 = vmatmul.mubr.bf16.gmra.mxu1 %v902_v15  ;;  %v893_v22 = vmax.f32 %v867_v17, 0.0  ;;  %v1201_v17 = vld [vmem:[#allocation11] sm:$0xff] }
 0x1dd   : > { %v2613_v19 = vpop.f32.mrf.mxu0  ;;  %2740 = vmatpush3.msra.mxu1 %v1204_v6 }
 0x1de   : > { %v870_v20 = vadd.f32 %v2612_v18, %v3789_v12  ;;  %2741 = vmatprep.subr.mxu1 %v1203_v8 }
 0x1df   : > { %v2614_v21 = vpop.f32.mrf.mxu0  ;;  %2742 = vmatpush3.msra.mxu1 %v1203_v8 }
 0x1e0   : > { %v894_v23 = vmax.f32 %v870_v20, 0.0  ;;  %v2615_v24 = vadd.f32 %v2614_v21, %v2613_v19  ;;  %2743 = vmatprep.subr.mxu1 %v1202_v11 }
 0x1e1   : > { %v2616_v25 = vpop.f32.mrf.mxu0  ;;  %2744 = vmatpush3.msra.mxu1 %v1202_v11 }
 0x1e2   : > { %v903_v26 = vpack.c.bf16 %v894_v23, %v893_v22  ;;  %v875_v28 = vadd.f32 %v2615_v24, %v3789_v12  ;;  %2745 = vmatprep.subr.mxu1 %v1201_v17 }
 0x1e3   : > { %v2617_v27 = vpop.f32.mrf.mxu0  ;;  %2746 = vmatpush3.msra.mxu1 %v1201_v17 }
 0x1e4   : > { %v2618_v29 = vadd.f32 %v2617_v27, %v2616_v25  ;;  %2711 = vmatprep.mubr.bf16.mxu1 %v903_v26  ;;  %v895_v31 = vmax.f32 %v875_v28, 0.0 }
 0x1e6   : > { %v878_v30 = vadd.f32 %v2618_v29, %v3789_v12 }
 0x1e8   : > { %v896_v32 = vmax.f32 %v878_v30, 0.0 }
 0x1ea   : > { %v904_v33 = vpack.c.bf16 %v896_v32, %v895_v31 }
 0x1ec   : > { %2712 = vmatmul.mubr.bf16.gmra.mxu1 %v904_v33 }
 0x27c   : > { %v2701_v39 = vpop.f32.mrf.mxu1 }
 0x27d   : > { %v3810_v12 = vadd.f32 %v2701_v39, %v3807_v38  ;;  %v2978_v39 = vld [vmem:[#allocation13 + $0x18] sm:$0xff]  }
 0x27e   : > { %v1010_v40 = vpop.f32.mrf.mxu1 }
 0x27f   : > { %v3813_v41 = vadd.f32 %v3807_v38, %v1010_v40  ;;  %v1075_v42 = vmul.f32 %v3810_v12, %v3810_v12  ;;  %v2979_v40 = vld [vmem:[#allocation13 + $0x10] sm:$0xff]  }
 0x280   : > { %v2702_v43 = vpop.f32.mrf.mxu1 }
 0x281   : > { %v3818_v44 = vadd.f32 %v2702_v43, %v3807_v38  ;;  %1093 = vadd.xlane.f32.xlu1 %v1075_v42  ;;  %v1073_v45 = vmul.f32 %v3813_v41, %v3813_v41 }
 0x282   : > { %v1013_v46 = vpop.f32.mrf.mxu1 }
 0x283   : > { %v3823_v47 = vadd.f32 %v3807_v38, %v1013_v46  ;;  %1089 = vadd.xlane.f32.xlu0 %v1073_v45  ;;  %v1076_v48 = vmul.f32 %v3818_v44, %v3818_v44 }
 0x285   : > { %1095 = vadd.xlane.f32.xlu1 %v1076_v48  ;;  %v1074_v49 = vmul.f32 %v3823_v47, %v3823_v47 }
 0x287   : > { %1091 = vadd.xlane.f32.xlu0 %v1074_v49 }
 0x28c   : > { %v2705_v51 = vpop.f32.mrf.mxu1 }
 0x28d   : > { %v3833_v57 = vadd.f32 %v2705_v51, %v3807_v38 }
 0x28e   : > { %v1026_v53 = vpop.f32.mrf.mxu1 }
 0x28f   : > { %v3830_v54 = vadd.f32 %v3807_v38, %v1026_v53  ;;  %v1079_v1 = vmul.f32 %v3833_v57, %v3833_v57 }
 0x290   : > { %v2706_v56 = vpop.f32.mrf.mxu1 }
 0x291   : > { %v1077_v58 = vmul.f32 %v3830_v54, %v3830_v54  ;;  %v3841_v63 = vadd.f32 %v2706_v56, %v3807_v38 }
 0x292   : > { %v1029_v60 = vpop.f32.mrf.mxu1 }
 0x293   : > { %v3838_v61 = vadd.f32 %v3807_v38, %v1029_v60  ;;  %1097 = vadd.xlane.f32.xlu0 %v1077_v58  ;;  %v1080_v4 = vmul.f32 %v3841_v63, %v3841_v63 }
 0x295   : > { %v1078_v0 = vmul.f32 %v3838_v61, %v3838_v61 }
 0x297   : > { %1099 = vadd.xlane.f32.xlu1 %v1078_v0  ;;  %1101 = vadd.xlane.f32.xlu0 %v1079_v1 }
 0x29b   : > { %1103 = vadd.xlane.f32.xlu1 %v1080_v4 }
 0x29c   : > { %v2709_v7 = vpop.f32.mrf.mxu1 }
 0x29d   : > { %v3853_v14 = vadd.f32 %v2709_v7, %v3807_v38 }
 0x29e   : > { %v1042_v9 = vpop.f32.mrf.mxu1 }
 0x29f   : > { %v3850_v10 = vadd.f32 %v3807_v38, %v1042_v9  ;;  %v1083_v21 = vmul.f32 %v3853_v14, %v3853_v14 }
 0x2a0   : > { %v2710_v13 = vpop.f32.mrf.mxu1 }
 0x2a1   : > { %v1081_v15 = vmul.f32 %v3850_v10, %v3850_v10  ;;  %v3861_v19 = vadd.f32 %v2710_v13, %v3807_v38 }
 0x2a2   : > { %v1045_v16 = vpop.f32.mrf.mxu1 }
 0x2a3   : > { %v3858_v18 = vadd.f32 %v3807_v38, %v1045_v16  ;;  %1105 = vadd.xlane.f32.xlu0 %v1081_v15  ;;  %v1084_v22 = vmul.f32 %v3861_v19, %v3861_v19 }
 0x2a5   : > { %v1082_v20 = vmul.f32 %v3858_v18, %v3858_v18 }
 0x2a7   : > { %1107 = vadd.xlane.f32.xlu1 %v1082_v20  ;;  %1109 = vadd.xlane.f32.xlu0 %v1083_v21 }
 0x2ab   : > { %1111 = vadd.xlane.f32.xlu1 %v1084_v22 }
 0x2ac   : > { %v2713_v23 = vpop.f32.mrf.mxu1 }
 0x2ad   : > { %v3873_v27 = vadd.f32 %v2713_v23, %v3807_v38 }
 0x2ae   : > { %v1058_v24 = vpop.f32.mrf.mxu1 }
 0x2af   : > { %v3870_v25 = vadd.f32 %v3807_v38, %v1058_v24  ;;  %v1087_v33 = vmul.f32 %v3873_v27, %v3873_v27 }
 0x2b0   : > { %v2714_v26 = vpop.f32.mrf.mxu1 }
 0x2b1   : > { %v1085_v28 = vmul.f32 %v3870_v25, %v3870_v25  ;;  %v3881_v31 = vadd.f32 %v2714_v26, %v3807_v38 }
 0x2b2   : > { %v1061_v29 = vpop.f32.mrf.mxu1 }
 0x2b3   : > { %v3878_v30 = vadd.f32 %v3807_v38, %v1061_v29  ;;  %1113 = vadd.xlane.f32.xlu0 %v1085_v28  ;;  %v1088_v34 = vmul.f32 %v3881_v31, %v3881_v31  ;;  %v2977_v38 = vld [vmem:[#allocation13 + $0x20] sm:$0xff]  }
 0x2b4   : > { %2777 = vmatprep.subr.bf16.mxu0 %v2977_v38 }
 0x2b5   : > { %v1086_v32 = vmul.f32 %v3878_v30, %v3878_v30  ;;  %2778 = vmatpush3.bf16.msra.mxu0 %v2977_v38 }
 0x2b6   : > { %2779 = vmatprep.subr.bf16.mxu0 %v2978_v39 }
 0x2b7   : > { %1115 = vadd.xlane.f32.xlu1 %v1086_v32  ;;  %1117 = vadd.xlane.f32.xlu0 %v1087_v33 }
 0x2b9   : > { %2780 = vmatpush3.bf16.msra.mxu0 %v2978_v39 }
 0x2ba   : > { %2781 = vmatprep.subr.bf16.mxu0 %v2979_v40 }
 0x2bb   : > { %1119 = vadd.xlane.f32.xlu1 %v1088_v34 }
 0x2bd   : > { %2782 = vmatpush3.bf16.msra.mxu0 %v2979_v40 }
 0x30a   : > { %v1094_v42 = vpop.xlane.xlu1 %1093 }
 0x30b   : > { %3006 = vrsqrt.f32 %v1094_v42  ;;  %vm1123_vm1 = vcmp.gt.f32.partialorder %v1094_v42, 0.0 }
 0x30c   : > { %v1090_v43 = vpop.xlane.xlu0 %1089 }
 0x30d   : > { %3008 = vrsqrt.f32 %v1090_v43  ;;  %vm1121_vm0 = vcmp.gt.f32.partialorder %v1090_v43, 0.0 }
 0x30e   : > { %v1096_v45 = vpop.xlane.xlu1 %1095 }
 0x30f   : > { %3010 = vrsqrt.f32 %v1096_v45  ;;  %vm1124_vm2 = vcmp.gt.f32.partialorder %v1096_v45, 0.0 }
 0x310   : > { %v1092_v46 = vpop.xlane.xlu0 %1091 }
 0x311   : > { %3012 = vrsqrt.f32 %v1092_v46  ;;  %vm1122_vm3 = vcmp.gt.f32.partialorder %v1092_v46, 0.0 }
 0x318   : > { %v3007_v48 = vpop.eup %3006 }
 0x319   : > { %v1155_v52 = vsel %vm1123_vm1, %v3007_v48, 0.0 }
 0x31a   : > { %v3009_v49 = vpop.eup %3008  ;;  %v1171_v59 = vmul.f32 8.0, %v1155_v52 }
 0x31b   : > { %v1153_v50 = vsel %vm1121_vm0, %v3009_v49, 0.0 }
 0x31c   : > { %v3011_v51 = vpop.eup %3010  ;;  %v1169_v53 = vmul.f32 8.0, %v1153_v50  ;;  %v1098_v55 = vpop.xlane.xlu0 %1097  ;;  %v1187_v5 = vmul.f32 %v1171_v59, %v3810_v12 }
 0x31d   : > { %3014 = vrsqrt.f32 %v1098_v55  ;;  %v1156_v60 = vsel %vm1124_vm2, %v3011_v51, 0.0  ;;  %vm1125_vm4 = vcmp.gt.f32.partialorder %v1098_v55, 0.0 }
 0x31e   : > { %v3013_v56 = vpop.eup %3012  ;;  %v1185_v58 = vmul.f32 %v1169_v53, %v3813_v41  ;;  %v1172_v3 = vmul.f32 8.0, %v1156_v60 }
 0x31f   : > { %v1154_v62 = vsel %vm1122_vm3, %v3013_v56, 0.0 }
 0x320   : > { %v1170_v0 = vmul.f32 8.0, %v1154_v62  ;;  %v1100_v1 = vpop.xlane.xlu1 %1099  ;;  %2747 = vmatprep.mubr.f32.mxu1 %v1185_v58  ;;  %v1102_v2 = vpop.xlane.xlu0 %1101  ;;  %v1188_v41 = vmul.f32 %v1172_v3, %v3818_v44 }
 0x321   : > { %3016 = vrsqrt.f32 %v1100_v1  ;;  %vm1126_vm5 = vcmp.gt.f32.partialorder %v1100_v1, 0.0  ;;  %vm1127_vm6 = vcmp.gt.f32.partialorder %v1102_v2, 0.0 }
 0x322   : > { %v1186_v4 = vmul.f32 %v1170_v0, %v3823_v47  ;;  %3018 = vrsqrt.f32 %v1102_v2 }
 0x324   : > { %v1104_v6 = vpop.xlane.xlu1 %1103  ;;  %2748 = vmatmul.mubr.f32.vlgmr.msra.gmra.mxu1 %v1186_v4  ;;  %v2981_v4 = vld [vmem:[#allocation13] sm:$0xff]  }
 0x325   : > { %3020 = vrsqrt.f32 %v1104_v6  ;;  %2750 = vmatprep.mubr.f32.mxu1 %v1187_v5  ;;  %vm1128_vm7 = vcmp.gt.f32.partialorder %v1104_v6, 0.0  ;;  %v2984_v5 = vld [vmem:[#allocation16 + $0x74] ss:$8 sps:$4 sm:$0xff]   ;;  %v2982_v6 = vld [vmem:[#allocation16 + $0x70] ss:$8 sps:$4 sm:$0xff]  }
 0x326   : > { %2803 = vmatprep.subr.bf16.mxu1 %v2984_v5 }
 0x327   : > { %2811 = vmatpush1.bf16.msra.mxu1 %v2982_v6 }
 0x328   : > { %2751 = vmatmul.mubr.f32.gmra.mxu1 %v1188_v41  ;;  %v2987_v41 = vld [vmem:[#allocation16 + $0x64] ss:$8 sps:$4 sm:$0xff]  }
 0x329   : > { %2804 = vmatprep.subr.bf16.mxu1 %v2987_v41 }
 0x32a   : > { %v3015_v7 = vpop.eup %3014 }
 0x32b   : > { %v1157_v8 = vsel %vm1125_vm4, %v3015_v7, 0.0  ;;  %v2993_v7 = vld [vmem:[#allocation16 + $0x44] ss:$8 sps:$4 sm:$0xff]  }
 0x32c   : > { %v1173_v9 = vmul.f32 8.0, %v1157_v8  ;;  %v1106_v11 = vpop.xlane.xlu0 %1105  ;;  %v2991_v8 = vld [vmem:[#allocation16 + $0x40] ss:$8 sps:$4 sm:$0xff]  }
 0x32d   : > { %3022 = vrsqrt.f32 %v1106_v11  ;;  %vm1129_vm8 = vcmp.gt.f32.partialorder %v1106_v11, 0.0  ;;  %v2994_v11 = vld [vmem:[#allocation16 + $0x30] ss:$8 sps:$4 sm:$0xff]  }
 0x32e   : > { %v3017_v13 = vpop.eup %3016  ;;  %v1189_v47 = vmul.f32 %v1173_v9, %v3830_v54  ;;  %v2996_v9 = vld [vmem:[#allocation16 + $0x34] ss:$8 sps:$4 sm:$0xff]  }
 0x32f   : > { %v3019_v15 = vpop.eup %3018  ;;  %v1158_v16 = vsel %vm1126_vm5, %v3017_v13, 0.0  ;;  %v1218_v13 = vld [vmem:[%s3732_s16 + $0x8] sm:$0xff] }
 0x330   : > { %v1174_v12 = vmul.f32 8.0, %v1158_v16  ;;  %v1159_v17 = vsel %vm1127_vm6, %v3019_v15, 0.0  ;;  %v1108_v20 = vpop.xlane.xlu1 %1107  ;;  %2753 = vmatprep.mubr.f32.mxu1 %v1189_v47  ;;  %v1110_v21 = vpop.xlane.xlu0 %1109  ;;  %v1217_v15 = vld [vmem:[%s3732_s16] sm:$0xff] }
 0x331   : > { %v1175_v44 = vmul.f32 8.0, %v1159_v17  ;;  %3024 = vrsqrt.f32 %v1108_v20  ;;  %vm1130_vm9 = vcmp.gt.f32.partialorder %v1108_v20, 0.0  ;;  %vm1131_vm10 = vcmp.gt.f32.partialorder %v1110_v21, 0.0  ;;  %v1220_v20 = vld [vmem:[%s3732_s16 + $0x18] sm:$0xff] }
 0x332   : > { %v3021_v22 = vpop.eup %3020  ;;  %3026 = vrsqrt.f32 %v1110_v21  ;;  %v1190_v23 = vmul.f32 %v1174_v12, %v3838_v61 }
 0x333   : > { %v1160_v24 = vsel %vm1128_vm7, %v3021_v22, 0.0  ;;  %v1191_v26 = vmul.f32 %v1175_v44, %v3833_v57  ;;  %v1219_v44 = vld [vmem:[%s3732_s16 + $0x10] sm:$0xff] }
 0x334   : > { %v1176_v28 = vmul.f32 8.0, %v1160_v24  ;;  %v1112_v54 = vpop.xlane.xlu1 %1111  ;;  %2754 = vmatmul.mubr.f32.gmra.mxu1 %v1190_v23 }
 0x335   : > { %3028 = vrsqrt.f32 %v1112_v54  ;;  %2756 = vmatprep.mubr.f32.mxu1 %v1191_v26  ;;  %vm1132_vm11 = vcmp.gt.f32.partialorder %v1112_v54, 0.0  ;;  %v1222_v54 = vld [vmem:[%s3732_s16 + $0x28] sm:$0xff] }
 0x336   : > { %v1192_v29 = vmul.f32 %v1176_v28, %v3841_v63 }
 0x338   : > { %2757 = vmatmul.mubr.f32.gmra.mxu1 %v1192_v29 }
 0x33a   : > { %v3023_v32 = vpop.eup %3022 }
 0x33b   : > { %v1161_v33 = vsel %vm1129_vm8, %v3023_v32, 0.0  ;;  %v1221_v32 = vld [vmem:[%s3732_s16 + $0x20] sm:$0xff] }
 0x33c   : > { %v1177_v34 = vmul.f32 8.0, %v1161_v33  ;;  %v1114_v35 = vpop.xlane.xlu0 %1113 }
 0x33d   : > { %3030 = vrsqrt.f32 %v1114_v35  ;;  %vm1133_vm12 = vcmp.gt.f32.partialorder %v1114_v35, 0.0 }
 0x33e   : > { %v3025_v36 = vpop.eup %3024  ;;  %v1193_v61 = vmul.f32 %v1177_v34, %v3850_v10 }
 0x33f   : > { %v3027_v37 = vpop.eup %3026  ;;  %v1162_v57 = vsel %vm1130_vm9, %v3025_v36, 0.0  ;;  %v1224_v36 = vld [vmem:[%s3732_s16 + $0x38] sm:$0xff] }
 0x340   : > { %v1178_v38 = vmul.f32 8.0, %v1162_v57  ;;  %v1163_v39 = vsel %vm1131_vm10, %v3027_v37, 0.0  ;;  %v1116_v40 = vpop.xlane.xlu1 %1115  ;;  %2759 = vmatprep.mubr.f32.mxu1 %v1193_v61  ;;  %v1118_v42 = vpop.xlane.xlu0 %1117  ;;  %v1223_v37 = vld [vmem:[%s3732_s16 + $0x30] sm:$0xff] }
 0x341   : > { %v1179_v63 = vmul.f32 8.0, %v1163_v39  ;;  %3032 = vrsqrt.f32 %v1116_v40  ;;  %vm1134_vm13 = vcmp.gt.f32.partialorder %v1116_v40, 0.0  ;;  %vm1135_vm14 = vcmp.gt.f32.partialorder %v1118_v42, 0.0 }
 0x342   : > { %v3029_v43 = vpop.eup %3028  ;;  %3034 = vrsqrt.f32 %v1118_v42  ;;  %v1194_v45 = vmul.f32 %v1178_v38, %v3858_v18 }
 0x343   : > { %v1164_v46 = vsel %vm1132_vm11, %v3029_v43, 0.0  ;;  %v1195_v48 = vmul.f32 %v1179_v63, %v3853_v14  ;;  %v1226_v63 = vld [vmem:[%s3732_s16 + $0x48] sm:$0xff] }
 0x344   : > { %v1180_v49 = vmul.f32 8.0, %v1164_v46  ;;  %v1120_v10 = vpop.xlane.xlu1 %1119  ;;  %2760 = vmatmul.mubr.f32.gmra.mxu1 %v1194_v45  ;;  %v1225_v45 = vld [vmem:[%s3732_s16 + $0x40] sm:$0xff] }
 0x345   : > { %3036 = vrsqrt.f32 %v1120_v10  ;;  %2762 = vmatprep.mubr.f32.mxu1 %v1195_v48  ;;  %vm1136_vm15 = vcmp.gt.f32.partialorder %v1120_v10, 0.0  ;;  %v1228_v10 = vld [vmem:[%s3732_s16 + $0x58] sm:$0xff] }
 0x346   : > { %v1196_v50 = vmul.f32 %v1180_v49, %v3861_v19 }
 0x348   : > { %2763 = vmatmul.mubr.f32.gmra.mxu1 %v1196_v50 }
 0x34a   : > { %v3031_v51 = vpop.eup %3030 }
 0x34b   : > { %v1165_v52 = vsel %vm1133_vm12, %v3031_v51, 0.0  ;;  %v1227_v51 = vld [vmem:[%s3732_s16 + $0x50] sm:$0xff] }
 0x34c   : > { %v1181_v53 = vmul.f32 8.0, %v1165_v52 }
 0x34e   : > { %v3033_v55 = vpop.eup %3032  ;;  %v1197_v56 = vmul.f32 %v1181_v53, %v3870_v25  ;;  %v2980_v25 = vld [vmem:[#allocation13 + $0x8] sm:$0xff]  }
 0x34f   : > { %v3035_v18 = vpop.eup %3034  ;;  %v1166_v58 = vsel %vm1134_vm13, %v3033_v55, 0.0  ;;  %2783 = vmatprep.subr.bf16.mxu0 %v2980_v25 }
 0x350   : > { %v1182_v14 = vmul.f32 8.0, %v1166_v58  ;;  %v1167_v59 = vsel %vm1135_vm14, %v3035_v18, 0.0  ;;  %2765 = vmatprep.mubr.f32.mxu1 %v1197_v56  ;;  %2784 = vmatpush3.bf16.msra.mxu0 %v2980_v25  ;;  %v1230_v58 = vld [vmem:[%s3732_s16 + $0x68] sm:$0xff] }
 0x351   : > { %v1183_v60 = vmul.f32 8.0, %v1167_v59  ;;  %2785 = vmatprep.subr.bf16.mxu0 %v2981_v4  ;;  %v1229_v59 = vld [vmem:[%s3732_s16 + $0x60] sm:$0xff] }
 0x352   : > { %v3037_v62 = vpop.eup %3036  ;;  %v1198_v19 = vmul.f32 %v1182_v14, %v3878_v30  ;;  %v2990_v30 = vld [vmem:[#allocation16 + $0x54] ss:$8 sps:$4 sm:$0xff]  }
 0x353   : > { %v1168_v0 = vsel %vm1136_vm15, %v3037_v62, 0.0  ;;  %v1199_v1 = vmul.f32 %v1183_v60, %v3873_v27  ;;  %v2985_v27 = vld [vmem:[#allocation16 + $0x60] ss:$8 sps:$4 sm:$0xff]  }
 0x354   : > { %v1184_v2 = vmul.f32 8.0, %v1168_v0  ;;  %2766 = vmatmul.mubr.f32.gmra.mxu1 %v1198_v19  ;;  %2786 = vmatpush3.bf16.msra.mxu0 %v2981_v4  ;;  %v1232_v0 = vld [vmem:[%s3732_s16 + $0x78] sm:$0xff] }
 0x355   : > { %2768 = vmatprep.mubr.f32.mxu1 %v1199_v1  ;;  %1686 = vmatprep.subr.bf16.mxu0 %v2984_v5 }
 0x356   : > { %v1200_v3 = vmul.f32 %v1184_v2, %v3881_v31  ;;  %2812 = vmatpush1.bf16.msra.mxu1 %v2985_v27  ;;  %v2988_v31 = vld [vmem:[#allocation16 + $0x50] ss:$8 sps:$4 sm:$0xff]  }
 0x357   : > { %2805 = vmatprep.subr.bf16.mxu1 %v2990_v30  ;;  %v1231_v2 = vld [vmem:[%s3732_s16 + $0x70] sm:$0xff] }
 0x358   : > { %2769 = vmatmul.mubr.f32.gmra.mxu1 %v1200_v3 }
 0x35a   : > { %2813 = vmatpush1.bf16.msra.mxu1 %v2988_v31 }
 0x35b   : > { %2806 = vmatprep.subr.bf16.mxu1 %v2993_v7 }
 0x35e   : > { %2814 = vmatpush1.bf16.msra.mxu1 %v2991_v8 }
 0x35f   : > { %2807 = vmatprep.subr.bf16.mxu1 %v2996_v9 }
 0x362   : > { %2815 = vmatpush1.bf16.msra.mxu1 %v2994_v11 }
 0x3e4   : > { %v2749_v47 = vpop.f32.mrf.mxu1 }
 0x3e5   : > { %v1305_v12 = vadd.f32 %v2749_v47, %v1218_v13  ;;  %v2487_v47 = vld [vmem:[#allocation14] ss:$0 sm:$0xff] }
 0x3e6   : > { %v1299_v16 = vpop.f32.mrf.mxu1 }
 0x3e7   : > { %v1300_v17 = vadd.f32 %v1299_v16, %v1217_v15 }
 0x3e8   : > { %v2752_v21 = vpop.f32.mrf.mxu1 }
 0x3e9   : > { %v1378_v22 = vpack.c.bf16 %v1305_v12, %v1300_v17  ;;  %v1315_v24 = vadd.f32 %v2752_v21, %v1220_v20 }
 0x3ea   : > { %v1309_v23 = vpop.f32.mrf.mxu1 }
 0x3eb   : > { %v1310_v26 = vadd.f32 %v1309_v23, %v1219_v44  ;;  %2787 = vmatprep.mubr.bf16.mxu0 %v1378_v22 }
 0x3ed   : > { %v1379_v28 = vpack.c.bf16 %v1315_v24, %v1310_v26 }
 0x3ef   : > { %2788 = vmatmul.mubr.bf16.vlgmr.msra.gmra.mxu0 %v1379_v28 }
 0x3f0   : > { %1687 = vmatpush1.bf16.msra.mxu0 %v2982_v6 }
 0x3f1   : > { %1688 = vmatprep.subr.bf16.mxu0 %v2987_v41  ;;  %v2999_v41 = vld [vmem:[#allocation16 + $0x24] ss:$8 sps:$4 sm:$0xff]  }
 0x3f2   : > { %2808 = vmatprep.subr.bf16.mxu1 %v2999_v41 }
 0x3f4   : > { %v2755_v29 = vpop.f32.mrf.mxu1  ;;  %1689 = vmatpush1.bf16.msra.mxu0 %v2985_v27  ;;  %v2997_v27 = vld [vmem:[#allocation16 + $0x20] ss:$8 sps:$4 sm:$0xff]  }
 0x3f5   : > { %1690 = vmatprep.subr.bf16.mxu0 %v2990_v30  ;;  %v1325_v34 = vadd.f32 %v2755_v29, %v1222_v54  ;;  %2816 = vmatpush1.bf16.msra.mxu1 %v2997_v27  ;;  %v3002_v30 = vld [vmem:[#allocation16 + $0x14] ss:$8 sps:$4 sm:$0xff]  }
 0x3f6   : > { %v1319_v33 = vpop.f32.mrf.mxu1  ;;  %2809 = vmatprep.subr.bf16.mxu1 %v3002_v30 }
 0x3f7   : > { %v1320_v35 = vadd.f32 %v1319_v33, %v1221_v32 }
 0x3f8   : > { %v2758_v61 = vpop.f32.mrf.mxu1  ;;  %1691 = vmatpush1.bf16.msra.mxu0 %v2988_v31  ;;  %v3000_v31 = vld [vmem:[#allocation16 + $0x10] ss:$8 sps:$4 sm:$0xff]  }
 0x3f9   : > { %v1380_v57 = vpack.c.bf16 %v1325_v34, %v1320_v35  ;;  %1692 = vmatprep.subr.bf16.mxu0 %v2993_v7  ;;  %v1335_v39 = vadd.f32 %v2758_v61, %v1224_v36  ;;  %2817 = vmatpush1.bf16.msra.mxu1 %v3000_v31  ;;  %v3005_v7 = vld [vmem:[#allocation16 + $0x4] ss:$8 sps:$4 sm:$0xff]  }
 0x3fa   : > { %v1329_v38 = vpop.f32.mrf.mxu1  ;;  %2810 = vmatprep.subr.bf16.mxu1 %v3005_v7 }
 0x3fb   : > { %v1330_v40 = vadd.f32 %v1329_v38, %v1223_v37  ;;  %2791 = vmatprep.mubr.bf16.mxu0 %v1380_v57 }
 0x3fc   : > { %1693 = vmatpush1.bf16.msra.mxu0 %v2991_v8  ;;  %v3003_v8 = vld [vmem:[#allocation16] ss:$8 sps:$4 sm:$0xff]  }
 0x3fd   : > { %v1381_v42 = vpack.c.bf16 %v1335_v39, %v1330_v40  ;;  %1694 = vmatprep.subr.bf16.mxu0 %v2996_v9  ;;  %2818 = vmatpush1.bf16.msra.mxu1 %v3003_v8  ;;  %v3409_v9 = vmov 0  }
 0x3fe   : > { %1738 = vmatprep.mubr.bf16.mxu1 %v3409_v9 }
 0x3ff   : > { %2792 = vmatmul.mubr.bf16.gmra.mxu0 %v1381_v42 }
 0x400   : > { %1695 = vmatpush1.bf16.msra.mxu0 %v2994_v11 }
 0x401   : > { %1696 = vmatprep.subr.bf16.mxu0 %v2999_v41  ;;  %v1596_v41 = vlaneseq }
 0x404   : > { %v2761_v43 = vpop.f32.mrf.mxu1  ;;  %1697 = vmatpush1.bf16.msra.mxu0 %v2997_v27  ;;  %v1597_v27 = vshrl.u32 %v1596_v41, 7 }
 0x405   : > { %v1345_v48 = vadd.f32 %v2761_v43, %v1226_v63  ;;  %1698 = vmatprep.subr.bf16.mxu0 %v3002_v30 }
 0x406   : > { %v1339_v46 = vpop.f32.mrf.mxu1  ;;  %v3929_v30 = vsub.s32 0, %v1597_v27 }
 0x407   : > { %v1340_v49 = vadd.f32 %v1339_v46, %v1225_v45 }
 0x408   : > { %v2764_v50 = vpop.f32.mrf.mxu1  ;;  %1699 = vmatpush1.bf16.msra.mxu0 %v3000_v31  ;;  %v3931_v31 = vsub.s32 1, %v1597_v27 }
 0x409   : > { %v1382_v52 = vpack.c.bf16 %v1345_v48, %v1340_v49  ;;  %v1355_v55 = vadd.f32 %v2764_v50, %v1228_v10  ;;  %1700 = vmatprep.subr.bf16.mxu0 %v3005_v7  ;;  %v1594_v7 = vld [vmem:[%s4424_s10] sm:$0x3] }
 0x40a   : > { %v1349_v53 = vpop.f32.mrf.mxu1 }
 0x40b   : > { %v1350_v56 = vadd.f32 %v1349_v53, %v1227_v51  ;;  %2795 = vmatprep.mubr.bf16.mxu0 %v1382_v52 }
 0x40c   : > { %1701 = vmatpush1.bf16.msra.mxu0 %v3003_v8  ;;  %v3937_v8 = vrot.slane %v1594_v7, %v3929_v30 }
 0x40d   : > { %v1383_v18 = vpack.c.bf16 %v1355_v55, %v1350_v56 }
 0x40f   : > { %2796 = vmatmul.mubr.bf16.gmra.mxu0 %v1383_v18 }
 0x414   : > { %v2767_v14 = vpop.f32.mrf.mxu1 }
 0x415   : > { %v1365_v62 = vadd.f32 %v2767_v14, %v1230_v58 }
 0x416   : > { %v1359_v60 = vpop.f32.mrf.mxu1 }
 0x417   : > { %v1360_v19 = vadd.f32 %v1359_v60, %v1229_v59 }
 0x418   : > { %v2770_v1 = vpop.f32.mrf.mxu1 }
 0x419   : > { %v1384_v3 = vpack.c.bf16 %v1365_v62, %v1360_v19  ;;  %v1375_v4 = vadd.f32 %v2770_v1, %v1232_v0 }
 0x41a   : > { %v1369_v25 = vpop.f32.mrf.mxu1 }
 0x41b   : > { %v1370_v5 = vadd.f32 %v1369_v25, %v1231_v2  ;;  %2799 = vmatprep.mubr.bf16.mxu0 %v1384_v3 }
 0x41d   : > { %v1385_v6 = vpack.c.bf16 %v1375_v4, %v1370_v5 }
 0x41f   : > { %2800 = vmatmul.mubr.bf16.gmra.mxu0 %v1385_v6 }
 0x420   : > { %1718 = vmatprep.mubr.bf16.mxu0 %v3409_v9 }
 0x4af   : > { %v2789_v11 = vpop.f32.mrf.mxu0 }
 0x4b0   : > { %v1500_v23 = vadd.f32 %v2789_v11, %v2487_v47  ;;  %v3940_v11 = vrot.slane %v1594_v7, %v3931_v31 }
 0x4b1   : > { %v1491_v13 = vpop.f32.mrf.mxu0 }
 0x4b2   : > { %v1492_v16 = vadd.f32 %v2487_v47, %v1491_v13  ;;  %v1556_v28 = vmax.f32 %v1500_v23, 0.0 }
 0x4b3   : > { %v2790_v15 = vpop.f32.mrf.mxu0 }
 0x4b4   : > { %v1554_v20 = vmax.f32 %v1492_v16, 0.0  ;;  %v1503_v44 = vadd.f32 %v2790_v15, %v2487_v47 }
 0x4b5   : > { %v1494_v12 = vpop.f32.mrf.mxu0 }
 0x4b6   : > { %v1495_v17 = vadd.f32 %v2487_v47, %v1494_v12  ;;  %v1557_v24 = vmax.f32 %v1503_v44, 0.0 }
 0x4b8   : > { %v1555_v21 = vmax.f32 %v1495_v17, 0.0  ;;  %v1571_v29 = vpack.c.bf16 %v1557_v24, %v1556_v28 }
 0x4ba   : > { %v1570_v22 = vpack.c.bf16 %v1555_v21, %v1554_v20 }
 0x4bc   : > { %1719 = vmatmul.mubr.bf16.vlgmr.msra.gmra.mxu0 %v1570_v22 }
 0x4bd   : > { %1728 = vmatprep.mubr.bf16.mxu0 %v3409_v9 }
 0x4bf   : > { %v2793_v26 = vpop.f32.mrf.mxu0 }
 0x4c0   : > { %v1516_v38 = vadd.f32 %v2793_v26, %v2487_v47 }
 0x4c1   : > { %v1507_v54 = vpop.f32.mrf.mxu0 }
 0x4c2   : > { %v1508_v33 = vadd.f32 %v2487_v47, %v1507_v54  ;;  %v1560_v42 = vmax.f32 %v1516_v38, 0.0 }
 0x4c3   : > { %v2794_v32 = vpop.f32.mrf.mxu0 }
 0x4c4   : > { %1729 = vmatmul.mubr.bf16.gmra.mxu0 %v1571_v29  ;;  %v1558_v36 = vmax.f32 %v1508_v33, 0.0  ;;  %v1519_v37 = vadd.f32 %v2794_v32, %v2487_v47 }
 0x4c5   : > { %v1510_v34 = vpop.f32.mrf.mxu0 }
 0x4c6   : > { %v1511_v35 = vadd.f32 %v2487_v47, %v1510_v34  ;;  %v1561_v39 = vmax.f32 %v1519_v37, 0.0 }
 0x4c8   : > { %v1559_v61 = vmax.f32 %v1511_v35, 0.0  ;;  %v1573_v43 = vpack.c.bf16 %v1561_v39, %v1560_v42 }
 0x4ca   : > { %v1572_v57 = vpack.c.bf16 %v1559_v61, %v1558_v36 }
 0x4cc   : > { %1739 = vmatmul.mubr.bf16.vlgmr.msra.gmra.mxu1 %v1572_v57 }
 0x4cd   : > { %1748 = vmatprep.mubr.bf16.mxu1 %v3409_v9 }
 0x4cf   : > { %v2797_v40 = vpop.f32.mrf.mxu0 }
 0x4d0   : > { %v1532_v53 = vadd.f32 %v2797_v40, %v2487_v47 }
 0x4d1   : > { %v1523_v63 = vpop.f32.mrf.mxu0 }
 0x4d2   : > { %v1524_v46 = vadd.f32 %v2487_v47, %v1523_v63  ;;  %v1564_v18 = vmax.f32 %v1532_v53, 0.0 }
 0x4d3   : > { %v2798_v45 = vpop.f32.mrf.mxu0 }
 0x4d4   : > { %1749 = vmatmul.mubr.bf16.gmra.mxu1 %v1573_v43  ;;  %v1562_v10 = vmax.f32 %v1524_v46, 0.0  ;;  %v1535_v51 = vadd.f32 %v2798_v45, %v2487_v47 }
 0x4d5   : > { %v1526_v48 = vpop.f32.mrf.mxu0  ;;  %1758 = vmatprep.mubr.bf16.mxu1 %v3409_v9 }
 0x4d6   : > { %v1527_v49 = vadd.f32 %v2487_v47, %v1526_v48  ;;  %v1565_v55 = vmax.f32 %v1535_v51, 0.0 }
 0x4d8   : > { %v1563_v50 = vmax.f32 %v1527_v49, 0.0  ;;  %v1575_v14 = vpack.c.bf16 %v1565_v55, %v1564_v18 }
 0x4da   : > { %v1574_v52 = vpack.c.bf16 %v1563_v50, %v1562_v10 }
 0x4dc   : > { %1759 = vmatmul.mubr.bf16.gmra.mxu1 %v1574_v52 }
 0x4dd   : > { %1768 = vmatprep.mubr.bf16.mxu1 %v3409_v9 }
 0x4df   : > { %v2801_v56 = vpop.f32.mrf.mxu0 }
 0x4e0   : > { %v1548_v25 = vadd.f32 %v2801_v56, %v2487_v47 }
 0x4e1   : > { %v1539_v58 = vpop.f32.mrf.mxu0 }
 0x4e2   : > { %v1540_v60 = vadd.f32 %v2487_v47, %v1539_v58  ;;  %v1568_v5 = vmax.f32 %v1548_v25, 0.0 }
 0x4e3   : > { %v2802_v59 = vpop.f32.mrf.mxu0 }
 0x4e4   : > { %1769 = vmatmul.mubr.bf16.gmra.mxu1 %v1575_v14  ;;  %v1566_v0 = vmax.f32 %v1540_v60, 0.0  ;;  %v1551_v2 = vadd.f32 %v2802_v59, %v2487_v47 }
 0x4e5   : > { %v1542_v62 = vpop.f32.mrf.mxu0  ;;  %1778 = vmatprep.mubr.bf16.mxu1 %v3409_v9 }
 0x4e6   : > { %v1543_v19 = vadd.f32 %v2487_v47, %v1542_v62  ;;  %v1569_v4 = vmax.f32 %v1551_v2, 0.0 }
 0x4e8   : > { %v1567_v1 = vmax.f32 %v1543_v19, 0.0  ;;  %v1577_v6 = vpack.c.bf16 %v1569_v4, %v1568_v5 }
 0x4ea   : > { %v1576_v3 = vpack.c.bf16 %v1567_v1, %v1566_v0 }
 0x4ec   : > { %1779 = vmatmul.mubr.bf16.gmra.mxu1 %v1576_v3 }
 0x4ed   : > { %1788 = vmatprep.mubr.bf16.mxu1 %v3409_v9 }
 0x4f4   : > { %1789 = vmatmul.mubr.bf16.gmra.mxu1 %v1577_v6 }
 0x57c   : > { %v1720_v9 = vpop.f32.mrf.mxu0 }
 0x57d   : > { %v3943_v47 = vadd.f32 %v1720_v9, %v3937_v8 }
 0x57e   : > { %v1722_v13 = vpop.f32.mrf.mxu0 }
 0x57f   : > { %v3946_v15 = vadd.f32 %v1722_v13, %v3940_v11 }
 0x580   : > { %v1724_v16 = vpop.f32.mrf.mxu0 }
 0x581   : > { %v1799_v12 = vadd.f32 %v3946_v15, %v3943_v47  ;;  %v3951_v20 = vadd.f32 %v1724_v16, %v3937_v8 }
 0x582   : > { %v1726_v17 = vpop.f32.mrf.mxu0 }
 0x583   : > { %v3954_v21 = vadd.f32 %v1726_v17, %v3940_v11  ;;  %1800 = vadd.xlane.f32.xlu0 %v1799_v12 }
 0x584   : > { %v1730_v44 = vpop.f32.mrf.mxu0 }
 0x585   : > { %v1802_v22 = vadd.f32 %v3954_v21, %v3951_v20  ;;  %v3959_v24 = vadd.f32 %v1730_v44, %v3937_v8 }
 0x586   : > { %v1732_v23 = vpop.f32.mrf.mxu0 }
 0x587   : > { %v3962_v26 = vadd.f32 %v1732_v23, %v3940_v11  ;;  %1803 = vadd.xlane.f32.xlu1 %v1802_v22 }
 0x588   : > { %v1734_v28 = vpop.f32.mrf.mxu0 }
 0x589   : > { %v1805_v54 = vadd.f32 %v3962_v26, %v3959_v24  ;;  %v3967_v32 = vadd.f32 %v1734_v28, %v3937_v8 }
 0x58a   : > { %v1736_v29 = vpop.f32.mrf.mxu0 }
 0x58b   : > { %v3970_v33 = vadd.f32 %v1736_v29, %v3940_v11  ;;  %1806 = vadd.xlane.f32.xlu0 %v1805_v54 }
 0x58c   : > { %v1740_v34 = vpop.f32.mrf.mxu1 }
 0x58d   : > { %v1808_v35 = vadd.f32 %v3970_v33, %v3967_v32  ;;  %v3975_v61 = vadd.f32 %v1740_v34, %v3937_v8 }
 0x58e   : > { %v1742_v36 = vpop.f32.mrf.mxu1 }
 0x58f   : > { %v3978_v37 = vadd.f32 %v1742_v36, %v3940_v11  ;;  %1809 = vadd.xlane.f32.xlu1 %v1808_v35 }
 0x590   : > { %v1744_v57 = vpop.f32.mrf.mxu1 }
 0x591   : > { %v1811_v38 = vadd.f32 %v3978_v37, %v3975_v61  ;;  %v3983_v40 = vadd.f32 %v1744_v57, %v3937_v8 }
 0x592   : > { %v1746_v39 = vpop.f32.mrf.mxu1 }
 0x593   : > { %v3986_v42 = vadd.f32 %v1746_v39, %v3940_v11  ;;  %1812 = vadd.xlane.f32.xlu0 %v1811_v38 }
 0x594   : > { %v1750_v63 = vpop.f32.mrf.mxu1 }
 0x595   : > { %v1814_v43 = vadd.f32 %v3986_v42, %v3983_v40  ;;  %v3991_v46 = vadd.f32 %v1750_v63, %v3937_v8 }
 0x596   : > { %v1752_v45 = vpop.f32.mrf.mxu1 }
 0x597   : > { %v3994_v48 = vadd.f32 %v1752_v45, %v3940_v11  ;;  %1815 = vadd.xlane.f32.xlu1 %v1814_v43 }
 0x598   : > { %v1754_v49 = vpop.f32.mrf.mxu1 }
 0x599   : > { %v1817_v10 = vadd.f32 %v3994_v48, %v3991_v46  ;;  %v3999_v51 = vadd.f32 %v1754_v49, %v3937_v8 }
 0x59a   : > { %v1756_v50 = vpop.f32.mrf.mxu1 }
 0x59b   : > { %v4002_v52 = vadd.f32 %v1756_v50, %v3940_v11  ;;  %1818 = vadd.xlane.f32.xlu0 %v1817_v10 }
 0x59c   : > { %v1760_v53 = vpop.f32.mrf.mxu1 }
 0x59d   : > { %v1820_v55 = vadd.f32 %v4002_v52, %v3999_v51  ;;  %v4007_v18 = vadd.f32 %v1760_v53, %v3937_v8 }
 0x59e   : > { %v1762_v56 = vpop.f32.mrf.mxu1 }
 0x59f   : > { %v4010_v58 = vadd.f32 %v1762_v56, %v3940_v11  ;;  %1821 = vadd.xlane.f32.xlu1 %v1820_v55 }
 0x5a0   : > { %v1764_v14 = vpop.f32.mrf.mxu1 }
 0x5a1   : > { %v1823_v59 = vadd.f32 %v4010_v58, %v4007_v18  ;;  %v4015_v62 = vadd.f32 %v1764_v14, %v3937_v8 }
 0x5a2   : > { %v1766_v60 = vpop.f32.mrf.mxu1 }
 0x5a3   : > { %v4018_v19 = vadd.f32 %v1766_v60, %v3940_v11  ;;  %1824 = vadd.xlane.f32.xlu0 %v1823_v59 }
 0x5a4   : > { %v1770_v0 = vpop.f32.mrf.mxu1 }
 0x5a5   : > { %v1826_v1 = vadd.f32 %v4018_v19, %v4015_v62  ;;  %v4023_v3 = vadd.f32 %v1770_v0, %v3937_v8 }
 0x5a6   : > { %v1772_v2 = vpop.f32.mrf.mxu1 }
 0x5a7   : > { %v4026_v25 = vadd.f32 %v1772_v2, %v3940_v11  ;;  %1827 = vadd.xlane.f32.xlu1 %v1826_v1 }
 0x5a8   : > { %v1774_v4 = vpop.f32.mrf.mxu1 }
 0x5a9   : > { %v1829_v5 = vadd.f32 %v4026_v25, %v4023_v3  ;;  %v4031_v41 = vadd.f32 %v1774_v4, %v3937_v8 }
 0x5aa   : > { %v1776_v6 = vpop.f32.mrf.mxu1 }
 0x5ab   : > { %v4034_v27 = vadd.f32 %v1776_v6, %v3940_v11  ;;  %1830 = vadd.xlane.f32.xlu0 %v1829_v5 }
 0x5ac   : > { %v1780_v7 = vpop.f32.mrf.mxu1 }
 0x5ad   : > { %v1832_v9 = vadd.f32 %v4034_v27, %v4031_v41  ;;  %v4039_v16 = vadd.f32 %v1780_v7, %v3937_v8 }
 0x5ae   : > { %v1782_v13 = vpop.f32.mrf.mxu1 }
 0x5af   : > { %v4042_v12 = vadd.f32 %v1782_v13, %v3940_v11  ;;  %1833 = vadd.xlane.f32.xlu1 %v1832_v9 }
 0x5b0   : > { %v1784_v17 = vpop.f32.mrf.mxu1 }
 0x5b1   : > { %v1835_v44 = vadd.f32 %v4042_v12, %v4039_v16  ;;  %v4047_v23 = vadd.f32 %v1784_v17, %v3937_v8 }
 0x5b2   : > { %v1786_v22 = vpop.f32.mrf.mxu1 }
 0x5b3   : > { %v4050_v28 = vadd.f32 %v1786_v22, %v3940_v11  ;;  %1836 = vadd.xlane.f32.xlu0 %v1835_v44 }
 0x5b4   : > { %v1790_v54 = vpop.f32.mrf.mxu1 }
 0x5b5   : > { %v1838_v29 = vadd.f32 %v4050_v28, %v4047_v23  ;;  %v4055_v35 = vadd.f32 %v1790_v54, %v3937_v8 }
 0x5b6   : > { %v1792_v34 = vpop.f32.mrf.mxu1 }
 0x5b7   : > { %v4058_v36 = vadd.f32 %v1792_v34, %v3940_v11  ;;  %1839 = vadd.xlane.f32.xlu1 %v1838_v29 }
 0x5b8   : > { %v1794_v57 = vpop.f32.mrf.mxu1 }
 0x5b9   : > { %v1841_v38 = vadd.f32 %v4058_v36, %v4055_v35  ;;  %v4063_v63 = vadd.f32 %v1794_v57, %v3937_v8 }
 0x5ba   : > { %v1796_v39 = vpop.f32.mrf.mxu1 }
 0x5bb   : > { %v4066_v43 = vadd.f32 %v1796_v39, %v3940_v11  ;;  %1842 = vadd.xlane.f32.xlu0 %v1841_v38 }
 0x5bd   : > { %v1844_v45 = vadd.f32 %v4066_v43, %v4063_v63 }
 0x5bf   : > { %1845 = vadd.xlane.f32.xlu1 %v1844_v45 }
 0x60c   : > { %v1801_v49 = vpop.xlane.xlu0 %1800 }
 0x60d   : > { %v1848_v10 = vmul.f32 0.00390625, %v1801_v49 }
 0x60f   : > { %v4071_v50 = vsub.f32 %v3943_v47, %v1848_v10  ;;  %v4074_v53 = vsub.f32 %v3946_v15, %v1848_v10 }
 0x610   : > { %v1804_v55 = vpop.xlane.xlu1 %1803 }
 0x611   : > { %v1849_v56 = vmul.f32 0.00390625, %v1804_v55  ;;  %v1896_v8 = vmul.f32 %v4071_v50, %v4071_v50  ;;  %v1897_v11 = vmul.f32 %v4074_v53, %v4074_v53 }
 0x613   : > { %v4081_v14 = vsub.f32 %v3951_v20, %v1849_v56  ;;  %v4084_v59 = vsub.f32 %v3954_v21, %v1849_v56  ;;  %v1928_v60 = vadd.f32 %v1897_v11, %v1896_v8 }
 0x614   : > { %v1807_v47 = vpop.xlane.xlu0 %1806 }
 0x615   : > { %v1850_v0 = vmul.f32 0.00390625, %v1807_v47  ;;  %1929 = vadd.xlane.f32.xlu0 %v1928_v60  ;;  %v1898_v15 = vmul.f32 %v4081_v14, %v4081_v14  ;;  %v1899_v1 = vmul.f32 %v4084_v59, %v4084_v59 }
 0x617   : > { %v4091_v2 = vsub.f32 %v3959_v24, %v1850_v0  ;;  %v4094_v4 = vsub.f32 %v3962_v26, %v1850_v0  ;;  %v1931_v20 = vadd.f32 %v1899_v1, %v1898_v15 }
 0x618   : > { %v1810_v5 = vpop.xlane.xlu1 %1809 }
 0x619   : > { %v1851_v21 = vmul.f32 0.00390625, %v1810_v5  ;;  %1932 = vadd.xlane.f32.xlu1 %v1931_v20  ;;  %v1900_v6 = vmul.f32 %v4091_v2, %v4091_v2  ;;  %v1901_v7 = vmul.f32 %v4094_v4, %v4094_v4 }
 0x61b   : > { %v4101_v9 = vsub.f32 %v3967_v32, %v1851_v21  ;;  %v4104_v13 = vsub.f32 %v3970_v33, %v1851_v21  ;;  %v1934_v24 = vadd.f32 %v1901_v7, %v1900_v6 }
 0x61c   : > { %v1813_v17 = vpop.xlane.xlu0 %1812 }
 0x61d   : > { %v1852_v26 = vmul.f32 0.00390625, %v1813_v17  ;;  %1935 = vadd.xlane.f32.xlu0 %v1934_v24  ;;  %v1902_v44 = vmul.f32 %v4101_v9, %v4101_v9  ;;  %v1903_v22 = vmul.f32 %v4104_v13, %v4104_v13 }
 0x61f   : > { %v4111_v54 = vsub.f32 %v3975_v61, %v1852_v26  ;;  %v4114_v29 = vsub.f32 %v3978_v37, %v1852_v26  ;;  %v1937_v32 = vadd.f32 %v1903_v22, %v1902_v44 }
 0x620   : > { %v1816_v34 = vpop.xlane.xlu1 %1815 }
 0x621   : > { %v1853_v33 = vmul.f32 0.00390625, %v1816_v34  ;;  %1938 = vadd.xlane.f32.xlu1 %v1937_v32  ;;  %v1904_v57 = vmul.f32 %v4111_v54, %v4111_v54  ;;  %v1905_v38 = vmul.f32 %v4114_v29, %v4114_v29 }
 0x623   : > { %v4121_v39 = vsub.f32 %v3983_v40, %v1853_v33  ;;  %v4124_v45 = vsub.f32 %v3986_v42, %v1853_v33  ;;  %v1940_v61 = vadd.f32 %v1905_v38, %v1904_v57 }
 0x624   : > { %v1819_v49 = vpop.xlane.xlu0 %1818 }
 0x625   : > { %v1854_v37 = vmul.f32 0.00390625, %v1819_v49  ;;  %1941 = vadd.xlane.f32.xlu0 %v1940_v61  ;;  %v1906_v10 = vmul.f32 %v4121_v39, %v4121_v39  ;;  %v1907_v55 = vmul.f32 %v4124_v45, %v4124_v45 }
 0x627   : > { %v4131_v56 = vsub.f32 %v3991_v46, %v1854_v37  ;;  %v4134_v8 = vsub.f32 %v3994_v48, %v1854_v37  ;;  %v1943_v40 = vadd.f32 %v1907_v55, %v1906_v10 }
 0x628   : > { %v1822_v11 = vpop.xlane.xlu1 %1821 }
 0x629   : > { %v1855_v42 = vmul.f32 0.00390625, %v1822_v11  ;;  %1944 = vadd.xlane.f32.xlu1 %v1943_v40  ;;  %v1908_v60 = vmul.f32 %v4131_v56, %v4131_v56  ;;  %v1909_v47 = vmul.f32 %v4134_v8, %v4134_v8 }
 0x62b   : > { %v4141_v0 = vsub.f32 %v3999_v51, %v1855_v42  ;;  %v4144_v15 = vsub.f32 %v4002_v52, %v1855_v42  ;;  %v1946_v46 = vadd.f32 %v1909_v47, %v1908_v60 }
 0x62c   : > { %v1825_v1 = vpop.xlane.xlu0 %1824 }
 0x62d   : > { %v1856_v48 = vmul.f32 0.00390625, %v1825_v1  ;;  %1947 = vadd.xlane.f32.xlu0 %v1946_v46  ;;  %v1910_v20 = vmul.f32 %v4141_v0, %v4141_v0  ;;  %v1911_v5 = vmul.f32 %v4144_v15, %v4144_v15 }
 0x62f   : > { %v4151_v21 = vsub.f32 %v4007_v18, %v1856_v48  ;;  %v4154_v6 = vsub.f32 %v4010_v58, %v1856_v48  ;;  %v1949_v51 = vadd.f32 %v1911_v5, %v1910_v20 }
 0x630   : > { %v1828_v7 = vpop.xlane.xlu1 %1827 }
 0x631   : > { %v1857_v52 = vmul.f32 0.00390625, %v1828_v7  ;;  %1950 = vadd.xlane.f32.xlu1 %v1949_v51  ;;  %v1912_v24 = vmul.f32 %v4151_v21, %v4151_v21  ;;  %v1913_v17 = vmul.f32 %v4154_v6, %v4154_v6 }
 0x633   : > { %v4161_v26 = vsub.f32 %v4015_v62, %v1857_v52  ;;  %v4164_v44 = vsub.f32 %v4018_v19, %v1857_v52  ;;  %v1952_v18 = vadd.f32 %v1913_v17, %v1912_v24 }
 0x634   : > { %v1831_v22 = vpop.xlane.xlu0 %1830 }
 0x635   : > { %v1858_v58 = vmul.f32 0.00390625, %v1831_v22  ;;  %1953 = vadd.xlane.f32.xlu0 %v1952_v18  ;;  %v1914_v32 = vmul.f32 %v4161_v26, %v4161_v26  ;;  %v1915_v34 = vmul.f32 %v4164_v44, %v4164_v44 }
 0x637   : > { %v4171_v33 = vsub.f32 %v4023_v3, %v1858_v58  ;;  %v4174_v57 = vsub.f32 %v4026_v25, %v1858_v58  ;;  %v1955_v62 = vadd.f32 %v1915_v34, %v1914_v32 }
 0x638   : > { %v1834_v38 = vpop.xlane.xlu1 %1833 }
 0x639   : > { %v1859_v19 = vmul.f32 0.00390625, %v1834_v38  ;;  %1956 = vadd.xlane.f32.xlu1 %v1955_v62  ;;  %v1916_v61 = vmul.f32 %v4171_v33, %v4171_v33  ;;  %v1917_v49 = vmul.f32 %v4174_v57, %v4174_v57 }
 0x63b   : > { %v4181_v37 = vsub.f32 %v4031_v41, %v1859_v19  ;;  %v4184_v10 = vsub.f32 %v4034_v27, %v1859_v19  ;;  %v1958_v3 = vadd.f32 %v1917_v49, %v1916_v61 }
 0x63c   : > { %v1837_v55 = vpop.xlane.xlu0 %1836 }
 0x63d   : > { %v1860_v25 = vmul.f32 0.00390625, %v1837_v55  ;;  %1959 = vadd.xlane.f32.xlu0 %v1958_v3  ;;  %v1918_v40 = vmul.f32 %v4181_v37, %v4181_v37  ;;  %v1919_v11 = vmul.f32 %v4184_v10, %v4184_v10 }
 0x63f   : > { %v4191_v42 = vsub.f32 %v4039_v16, %v1860_v25  ;;  %v4194_v60 = vsub.f32 %v4042_v12, %v1860_v25  ;;  %v1961_v41 = vadd.f32 %v1919_v11, %v1918_v40 }
 0x640   : > { %v1840_v47 = vpop.xlane.xlu1 %1839 }
 0x641   : > { %v1861_v27 = vmul.f32 0.00390625, %v1840_v47  ;;  %1962 = vadd.xlane.f32.xlu1 %v1961_v41  ;;  %v1920_v46 = vmul.f32 %v4191_v42, %v4191_v42  ;;  %v1921_v1 = vmul.f32 %v4194_v60, %v4194_v60  ;;  %v2056_v41 = vld [vmem:[%s4425_s11] sm:$0x3] }
 0x642   : > { %v2100_v47 = vld [vmem:[%s4426_s12] sm:$0x3] }
 0x643   : > { %v4201_v48 = vsub.f32 %v4047_v23, %v1861_v27  ;;  %v4204_v20 = vsub.f32 %v4050_v28, %v1861_v27  ;;  %v1964_v16 = vadd.f32 %v1921_v1, %v1920_v46  ;;  %v4237_v1 = vrot.slane %v2056_v41, %v3929_v30 }
 0x644   : > { %v1843_v5 = vpop.xlane.xlu0 %1842 }
 0x645   : > { %v1862_v12 = vmul.f32 0.00390625, %v1843_v5  ;;  %1965 = vadd.xlane.f32.xlu0 %v1964_v16  ;;  %v1922_v51 = vmul.f32 %v4201_v48, %v4201_v48  ;;  %v1923_v7 = vmul.f32 %v4204_v20, %v4204_v20  ;;  %v4240_v16 = vrot.slane %v2056_v41, %v3931_v31 }
 0x647   : > { %v4211_v52 = vsub.f32 %v4055_v35, %v1862_v12  ;;  %v4214_v24 = vsub.f32 %v4058_v36, %v1862_v12  ;;  %v1967_v23 = vadd.f32 %v1923_v7, %v1922_v51  ;;  %v4243_v51 = vrot.slane %v2100_v47, %v3929_v30 }
 0x648   : > { %v1846_v17 = vpop.xlane.xlu1 %1845  ;;  %v4246_v7 = vrot.slane %v2100_v47, %v3931_v31 }
 0x649   : > { %v1863_v28 = vmul.f32 0.00390625, %v1846_v17  ;;  %1968 = vadd.xlane.f32.xlu1 %v1967_v23  ;;  %v1924_v18 = vmul.f32 %v4211_v52, %v4211_v52  ;;  %v1925_v22 = vmul.f32 %v4214_v24, %v4214_v24 }
 0x64b   : > { %v4221_v58 = vsub.f32 %v4063_v63, %v1863_v28  ;;  %v4224_v32 = vsub.f32 %v4066_v43, %v1863_v28  ;;  %v1970_v35 = vadd.f32 %v1925_v22, %v1924_v18 }
 0x64d   : > { %1971 = vadd.xlane.f32.xlu0 %v1970_v35  ;;  %v1926_v36 = vmul.f32 %v4221_v58, %v4221_v58  ;;  %v1927_v34 = vmul.f32 %v4224_v32, %v4224_v32 }
 0x64f   : > { %v1973_v62 = vadd.f32 %v1927_v34, %v1926_v36 }
 0x651   : > { %1974 = vadd.xlane.f32.xlu1 %v1973_v62 }
 0x69e   : > { %v1930_v38 = vpop.xlane.xlu0 %1929 }
 0x69f   : > { %v1976_v19 = vmul.f32 0.00390625, %v1930_v38 }
 0x6a1   : > { %v1992_v61 = vadd.f32 1e-05, %v1976_v19 }
 0x6a2   : > { %v1933_v49 = vpop.xlane.xlu1 %1932 }
 0x6a3   : > { %3038 = vrsqrt.f32 %v1992_v61  ;;  %v1977_v63 = vmul.f32 0.00390625, %v1933_v49 }
 0x6a5   : > { %v1993_v3 = vadd.f32 1e-05, %v1977_v63 }
 0x6a6   : > { %v1936_v55 = vpop.xlane.xlu0 %1935 }
 0x6a7   : > { %3040 = vrsqrt.f32 %v1993_v3  ;;  %v1978_v43 = vmul.f32 0.00390625, %v1936_v55 }
 0x6a9   : > { %v1994_v25 = vadd.f32 1e-05, %v1978_v43 }
 0x6aa   : > { %v1939_v40 = vpop.xlane.xlu1 %1938 }
 0x6ab   : > { %3042 = vrsqrt.f32 %v1994_v25  ;;  %v1979_v11 = vmul.f32 0.00390625, %v1939_v40 }
 0x6ad   : > { %v1995_v27 = vadd.f32 1e-05, %v1979_v11 }
 0x6ae   : > { %v1942_v46 = vpop.xlane.xlu0 %1941 }
 0x6af   : > { %3044 = vrsqrt.f32 %v1995_v27  ;;  %v1980_v5 = vmul.f32 0.00390625, %v1942_v46 }
 0x6b0   : > { %v3039_v12 = vpop.eup %3038 }
 0x6b1   : > { %v2024_v23 = vmul.f32 %v3039_v12, %v4071_v50  ;;  %v2025_v17 = vmul.f32 %v3039_v12, %v4074_v53  ;;  %v1996_v28 = vadd.f32 1e-05, %v1980_v5 }
 0x6b2   : > { %v1945_v18 = vpop.xlane.xlu1 %1944 }
 0x6b3   : > { %v2068_v22 = vmul.f32 %v4237_v1, %v2024_v23  ;;  %v2069_v35 = vmul.f32 %v4240_v16, %v2025_v17  ;;  %3046 = vrsqrt.f32 %v1996_v28  ;;  %v1981_v36 = vmul.f32 0.00390625, %v1945_v18 }
 0x6b4   : > { %v3041_v34 = vpop.eup %3040 }
 0x6b5   : > { %v2112_v30 = vadd.f32 %v4243_v51, %v2068_v22  ;;  %v2113_v62 = vadd.f32 %v4246_v7, %v2069_v35  ;;  %v2026_v31 = vmul.f32 %v3041_v34, %v4081_v14  ;;  %v2027_v50 = vmul.f32 %v3041_v34, %v4084_v59 }
 0x6b6   : > { %v1997_v38 = vadd.f32 1e-05, %v1981_v36  ;;  %v1948_v53 = vpop.xlane.xlu0 %1947 }
 0x6b7   : > { %v2537_v19 = vpack.c.bf16 %v2113_v62, %v2112_v30  ;;  %v2070_v61 = vmul.f32 %v4237_v1, %v2026_v31  ;;  %v2071_v49 = vmul.f32 %v4240_v16, %v2027_v50  ;;  %v1982_v63 = vmul.f32 0.00390625, %v1948_v53 }
 0x6b8   : > { %v3043_v3 = vpop.eup %3042  ;;  %3048 = vrsqrt.f32 %v1997_v38 }
 0x6b9   : > { %2240 = vst [vmem:[%s4260_s30] sm:$0xff] %v2537_v19  ;;  %v2114_v14 = vadd.f32 %v4243_v51, %v2070_v61  ;;  %v2115_v59 = vadd.f32 %v4246_v7, %v2071_v49  ;;  %v2028_v55 = vmul.f32 %v3043_v3, %v4091_v2  ;;  %v2029_v43 = vmul.f32 %v3043_v3, %v4094_v4 }
 0x6ba   : > { %v1998_v25 = vadd.f32 1e-05, %v1982_v63  ;;  %v1951_v40 = vpop.xlane.xlu1 %1950 }
 0x6bb   : > { %v2538_v11 = vpack.c.bf16 %v2115_v59, %v2114_v14  ;;  %v2072_v41 = vmul.f32 %v4237_v1, %v2028_v55  ;;  %v2073_v47 = vmul.f32 %v4240_v16, %v2029_v43  ;;  %v1983_v27 = vmul.f32 0.00390625, %v1951_v40 }
 0x6bc   : > { %v3045_v46 = vpop.eup %3044  ;;  %3050 = vrsqrt.f32 %v1998_v25 }
 0x6bd   : > { %2241 = vst [vmem:[%s4260_s30 + $0x8] sm:$0xff] %v2538_v11  ;;  %v2116_v5 = vadd.f32 %v4243_v51, %v2072_v41  ;;  %v2117_v12 = vadd.f32 %v4246_v7, %v2073_v47  ;;  %v2030_v2 = vmul.f32 %v3045_v46, %v4101_v9  ;;  %v2031_v4 = vmul.f32 %v3045_v46, %v4104_v13 }
 0x6be   : > { %v1999_v23 = vadd.f32 1e-05, %v1983_v27  ;;  %v1954_v17 = vpop.xlane.xlu0 %1953 }
 0x6bf   : > { %v2539_v28 = vpack.c.bf16 %v2117_v12, %v2116_v5  ;;  %v2074_v18 = vmul.f32 %v4237_v1, %v2030_v2  ;;  %v2075_v22 = vmul.f32 %v4240_v16, %v2031_v4  ;;  %v1984_v35 = vmul.f32 0.00390625, %v1954_v17 }
 0x6c0   : > { %v3047_v36 = vpop.eup %3046  ;;  %3052 = vrsqrt.f32 %v1999_v23 }
 0x6c1   : > { %2242 = vst [vmem:[%s4260_s30 + $0x10] sm:$0xff] %v2539_v28  ;;  %v2118_v34 = vadd.f32 %v4243_v51, %v2074_v18  ;;  %v2119_v30 = vadd.f32 %v4246_v7, %v2075_v22  ;;  %v2032_v9 = vmul.f32 %v3047_v36, %v4111_v54  ;;  %v2033_v13 = vmul.f32 %v3047_v36, %v4114_v29 }
 0x6c2   : > { %v2000_v62 = vadd.f32 1e-05, %v1984_v35  ;;  %v1957_v31 = vpop.xlane.xlu1 %1956 }
 0x6c3   : > { %v2540_v50 = vpack.c.bf16 %v2119_v30, %v2118_v34  ;;  %v2076_v38 = vmul.f32 %v4237_v1, %v2032_v9  ;;  %v2077_v53 = vmul.f32 %v4240_v16, %v2033_v13  ;;  %v1985_v19 = vmul.f32 0.00390625, %v1957_v31 }
 0x6c4   : > { %3054 = vrsqrt.f32 %v2000_v62 }
 0x6c5   : > { %v3049_v61 = vpop.eup %3048  ;;  %2243 = vst [vmem:[%s4260_s30 + $0x18] sm:$0xff] %v2540_v50  ;;  %v2120_v49 = vadd.f32 %v4243_v51, %v2076_v38  ;;  %v2121_v63 = vadd.f32 %v4246_v7, %v2077_v53  ;;  %v2001_v3 = vadd.f32 1e-05, %v1985_v19 }
 0x6c6   : > { %v2034_v54 = vmul.f32 %v3049_v61, %v4121_v39  ;;  %v2035_v29 = vmul.f32 %v3049_v61, %v4124_v45  ;;  %v1960_v14 = vpop.xlane.xlu0 %1959 }
 0x6c7   : > { %v2541_v59 = vpack.c.bf16 %v2121_v63, %v2120_v49  ;;  %3056 = vrsqrt.f32 %v2001_v3  ;;  %v1986_v55 = vmul.f32 0.00390625, %v1960_v14 }
 0x6c8   : > { %v2078_v43 = vmul.f32 %v4237_v1, %v2034_v54  ;;  %v2079_v25 = vmul.f32 %v4240_v16, %v2035_v29 }
 0x6c9   : > { %v3051_v40 = vpop.eup %3050  ;;  %2244 = vst [vmem:[%s4260_s30 + $0x20] sm:$0xff] %v2541_v59  ;;  %v2002_v11 = vadd.f32 1e-05, %v1986_v55 }
 0x6ca   : > { %v2122_v41 = vadd.f32 %v4243_v51, %v2078_v43  ;;  %v2123_v47 = vadd.f32 %v4246_v7, %v2079_v25  ;;  %v2036_v39 = vmul.f32 %v3051_v40, %v4131_v56  ;;  %v2037_v45 = vmul.f32 %v3051_v40, %v4134_v8  ;;  %v1963_v27 = vpop.xlane.xlu1 %1962 }
 0x6cb   : > { %3058 = vrsqrt.f32 %v2002_v11  ;;  %v1987_v46 = vmul.f32 0.00390625, %v1963_v27 }
 0x6cc   : > { %v2542_v5 = vpack.c.bf16 %v2123_v47, %v2122_v41  ;;  %v2080_v12 = vmul.f32 %v4237_v1, %v2036_v39  ;;  %v2081_v2 = vmul.f32 %v4240_v16, %v2037_v45 }
 0x6cd   : > { %v3053_v4 = vpop.eup %3052  ;;  %v2003_v23 = vadd.f32 1e-05, %v1987_v46 }
 0x6ce   : > { %2245 = vst [vmem:[%s4260_s30 + $0x28] sm:$0xff] %v2542_v5  ;;  %v2124_v17 = vadd.f32 %v4243_v51, %v2080_v12  ;;  %v2125_v28 = vadd.f32 %v4246_v7, %v2081_v2  ;;  %v2038_v56 = vmul.f32 %v3053_v4, %v4141_v0  ;;  %v2039_v8 = vmul.f32 %v3053_v4, %v4144_v15  ;;  %v1966_v18 = vpop.xlane.xlu0 %1965 }
 0x6cf   : > { %3060 = vrsqrt.f32 %v2003_v23  ;;  %v1988_v22 = vmul.f32 0.00390625, %v1966_v18 }
 0x6d0   : > { %v2543_v35 = vpack.c.bf16 %v2125_v28, %v2124_v17  ;;  %v2082_v36 = vmul.f32 %v4237_v1, %v2038_v56  ;;  %v2083_v34 = vmul.f32 %v4240_v16, %v2039_v8 }
 0x6d1   : > { %v3055_v30 = vpop.eup %3054  ;;  %v2004_v9 = vadd.f32 1e-05, %v1988_v22 }
 0x6d2   : > { %2246 = vst [vmem:[%s4260_s30 + $0x30] sm:$0xff] %v2543_v35  ;;  %v2126_v13 = vadd.f32 %v4243_v51, %v2082_v36  ;;  %v2127_v62 = vadd.f32 %v4246_v7, %v2083_v34  ;;  %v2040_v0 = vmul.f32 %v3055_v30, %v4151_v21  ;;  %v2041_v15 = vmul.f32 %v3055_v30, %v4154_v6  ;;  %v1969_v31 = vpop.xlane.xlu1 %1968 }
 0x6d3   : > { %3062 = vrsqrt.f32 %v2004_v9  ;;  %v1989_v50 = vmul.f32 0.00390625, %v1969_v31 }
 0x6d4   : > { %v3057_v38 = vpop.eup %3056  ;;  %v2544_v53 = vpack.c.bf16 %v2127_v62, %v2126_v13  ;;  %v2084_v19 = vmul.f32 %v4237_v1, %v2040_v0  ;;  %v2085_v61 = vmul.f32 %v4240_v16, %v2041_v15 }
 0x6d5   : > { %v2042_v49 = vmul.f32 %v3057_v38, %v4161_v26  ;;  %v2043_v63 = vmul.f32 %v3057_v38, %v4164_v44  ;;  %v2005_v3 = vadd.f32 1e-05, %v1989_v50 }
 0x6d6   : > { %2247 = vst [vmem:[%s4260_s30 + $0x38] sm:$0xff] %v2544_v53  ;;  %v2128_v21 = vadd.f32 %v4243_v51, %v2084_v19  ;;  %v2129_v6 = vadd.f32 %v4246_v7, %v2085_v61  ;;  %v1972_v54 = vpop.xlane.xlu0 %1971 }
 0x6d7   : > { %v2086_v29 = vmul.f32 %v4237_v1, %v2042_v49  ;;  %v2087_v14 = vmul.f32 %v4240_v16, %v2043_v63  ;;  %3064 = vrsqrt.f32 %v2005_v3  ;;  %v1990_v59 = vmul.f32 0.00390625, %v1972_v54 }
 0x6d8   : > { %v3059_v55 = vpop.eup %3058  ;;  %v2545_v43 = vpack.c.bf16 %v2129_v6, %v2128_v21 }
 0x6d9   : > { %v2130_v26 = vadd.f32 %v4243_v51, %v2086_v29  ;;  %v2131_v44 = vadd.f32 %v4246_v7, %v2087_v14  ;;  %v2044_v25 = vmul.f32 %v3059_v55, %v4171_v33  ;;  %v2045_v40 = vmul.f32 %v3059_v55, %v4174_v57 }
 0x6da   : > { %2248 = vst [vmem:[%s4260_s30 + $0x40] sm:$0xff] %v2545_v43  ;;  %v2006_v11 = vadd.f32 1e-05, %v1990_v59  ;;  %v1975_v41 = vpop.xlane.xlu1 %1974 }
 0x6db   : > { %v2546_v47 = vpack.c.bf16 %v2131_v44, %v2130_v26  ;;  %v2088_v39 = vmul.f32 %v4237_v1, %v2044_v25  ;;  %v2089_v45 = vmul.f32 %v4240_v16, %v2045_v40  ;;  %v1991_v27 = vmul.f32 0.00390625, %v1975_v41 }
 0x6dc   : > { %v3061_v46 = vpop.eup %3060  ;;  %3066 = vrsqrt.f32 %v2006_v11 }
 0x6dd   : > { %2249 = vst [vmem:[%s4260_s30 + $0x48] sm:$0xff] %v2546_v47  ;;  %v2132_v5 = vadd.f32 %v4243_v51, %v2088_v39  ;;  %v2133_v12 = vadd.f32 %v4246_v7, %v2089_v45  ;;  %v2046_v33 = vmul.f32 %v3061_v46, %v4181_v37  ;;  %v2047_v57 = vmul.f32 %v3061_v46, %v4184_v10 }
 0x6de   : > { %v2007_v2 = vadd.f32 1e-05, %v1991_v27 }
 0x6df   : > { %v2547_v4 = vpack.c.bf16 %v2133_v12, %v2132_v5  ;;  %v2090_v23 = vmul.f32 %v4237_v1, %v2046_v33  ;;  %v2091_v17 = vmul.f32 %v4240_v16, %v2047_v57 }
 0x6e0   : > { %v3063_v28 = vpop.eup %3062  ;;  %3068 = vrsqrt.f32 %v2007_v2 }
 0x6e1   : > { %2250 = vst [vmem:[%s4260_s30 + $0x50] sm:$0xff] %v2547_v4  ;;  %v2134_v56 = vadd.f32 %v4243_v51, %v2090_v23  ;;  %v2135_v8 = vadd.f32 %v4246_v7, %v2091_v17  ;;  %v2048_v18 = vmul.f32 %v3063_v28, %v4191_v42  ;;  %v2049_v37 = vmul.f32 %v3063_v28, %v4194_v60 }
 0x6e3   : > { %v2548_v10 = vpack.c.bf16 %v2135_v8, %v2134_v56  ;;  %v2092_v22 = vmul.f32 %v4237_v1, %v2048_v18  ;;  %v2093_v35 = vmul.f32 %v4240_v16, %v2049_v37 }
 0x6e4   : > { %v3065_v36 = vpop.eup %3064 }
 0x6e5   : > { %2251 = vst [vmem:[%s4260_s30 + $0x58] sm:$0xff] %v2548_v10  ;;  %v2136_v34 = vadd.f32 %v4243_v51, %v2092_v22  ;;  %v2137_v30 = vadd.f32 %v4246_v7, %v2093_v35  ;;  %v2050_v9 = vmul.f32 %v3065_v36, %v4201_v48  ;;  %v2051_v13 = vmul.f32 %v3065_v36, %v4204_v20 }
 0x6e7   : > { %v2549_v62 = vpack.c.bf16 %v2137_v30, %v2136_v34  ;;  %v2094_v42 = vmul.f32 %v4237_v1, %v2050_v9  ;;  %v2095_v60 = vmul.f32 %v4240_v16, %v2051_v13 }
 0x6e9   : > { %v3067_v0 = vpop.eup %3066  ;;  %2252 = vst [vmem:[%s4260_s30 + $0x60] sm:$0xff] %v2549_v62  ;;  %v2138_v15 = vadd.f32 %v4243_v51, %v2094_v42  ;;  %v2139_v31 = vadd.f32 %v4246_v7, %v2095_v60 }
 0x6ea   : > { %v2052_v50 = vmul.f32 %v3067_v0, %v4211_v52  ;;  %v2053_v48 = vmul.f32 %v3067_v0, %v4214_v24 }
 0x6eb   : > { %v2550_v38 = vpack.c.bf16 %v2139_v31, %v2138_v15 }
 0x6ec   : > { %v2096_v20 = vmul.f32 %v4237_v1, %v2052_v50  ;;  %v2097_v53 = vmul.f32 %v4240_v16, %v2053_v48 }
 0x6ed   : > { %v3069_v19 = vpop.eup %3068  ;;  %2253 = vst [vmem:[%s4260_s30 + $0x68] sm:$0xff] %v2550_v38 }
 0x6ee   : > { %v2140_v61 = vadd.f32 %v4243_v51, %v2096_v20  ;;  %v2141_v49 = vadd.f32 %v4246_v7, %v2097_v53  ;;  %v2054_v63 = vmul.f32 %v3069_v19, %v4221_v58  ;;  %v2055_v52 = vmul.f32 %v3069_v19, %v4224_v32 }
 0x6f0   : > { %v2551_v3 = vpack.c.bf16 %v2141_v49, %v2140_v61  ;;  %v2098_v24 = vmul.f32 %v4237_v1, %v2054_v63  ;;  %v2099_v21 = vmul.f32 %v4240_v16, %v2055_v52 }
 0x6f2   : > { %2254 = vst [vmem:[%s4260_s30 + $0x70] sm:$0xff] %v2551_v3  ;;  %v2142_v6 = vadd.f32 %v4243_v51, %v2098_v24  ;;  %v2143_v54 = vadd.f32 %v4246_v7, %v2099_v21 }
 0x6f4   : > { %v2552_v58 = vpack.c.bf16 %v2143_v54, %v2142_v6 }
 0x6f6   : > { %2255 = vst [vmem:[%s4260_s30 + $0x78] sm:$0xff] %v2552_v58 }
 0x6f7   : > { %3321 = shalt.err (!%p3318_p5)
}
 0x6f8   : > { %s3322_s16 = scalar_lea.hbm %s4368_s7, 2048  ;;  %s3326_s9 = scalar_lea.hbm %s4427_s13, 4096 }
 0x6f9   : > { %p3323_p2 = scmp.ne.s32.totalorder %s4368_s7, %s3322_s16  ;;  %p3327_p0 = scmp.lt.s32.totalorder %s4368_s7, %s4427_s13 }
 0x6fa   : > { %p3328_p13 = scmp.lt.s32.totalorder %s3326_s9, %s3322_s16 }
 0x6fb   : > { %p3324_p10 = pnand %p3323_p2, %p4482_p9 }
 0x6fc   : > { %p3329_p7 = por %p3328_p13, %p3327_p0 }
 0x6fd   : > { %p3325_p11 = pneg %p3324_p10 }
 0x6ff   : > { %p3330_p1 = pnand %p3329_p7, %p3325_p11 }
 0x701   : > { %3333 = shalt.err (!%p3330_p1)
}
 0x702   : > { %s3411_s8 = smov 128   ;;  %s3412_s0 = smov 8  }
 0x703   : > { %2851 = dma.vmem_to_hbm [thread:$0]  (%p4482_p9), %s4370_s18, 2048, %s4368_s7, %s2257_s5, %s3411_s8, %s3411_s8, %s3412_s0  }
 0x704 PF: > { %s4483_s29 = sld [smem:[#allocation28_spill]]  ;;  %s2286_s30 = sand.u32 1, %s3380_s25  }
 0x705   : > { %p4485_p6 = scmp.ge.s32.totalorder %s3392_s28, 2  ;;  %s2287_s22 = scalar_lea.sflag [#allocation4], %s2286_s30 }
 0x70a   : > { %p4484_p12 = scmp.ne.s32.totalorder %s4483_s29, 0 }
 0x70c   : > { %p2883_p8 = pnand %p4485_p6, %p4484_p12 }
 0x70e   : > { %p2884_p4 = pneg %p2883_p8 }
 0x710   : > { %3375 = dma.done.wait (%p2884_p4), %s2287_s22, 2048  }
 0x711   : > { %3377 = vsyncadd (%p2884_p4), %s2287_s22, 4294965248  ;;  %s4486_s28 = sld [smem:[#allocation26_spill]]  ;;  %s4489_s25 = smov %s3384_s26 }
 0x712   : > { %s4487_s4 = sld [smem:[#allocation25_spill]] }
 0x713   : > { %s4488_s27 = sld [smem:[#allocation27_spill]] }
 0x717   : > { %p32_p3 = scmp.ge.s32.totalorder %s4486_s28, 4  }
 0x718   : > { %s4490_s26 = smov %s4487_s4 }
 0x719   :  { %34 = sbr.rel (!%p32_p3) target bundleno = 19 (0x13), region = 158 }
 0x71e   :  { %2292 = vsyncpa [#allocation3], 1 }
 0x71f   :  { %2294 = vsyncpa [#allocation3 + $0x1], 1 }
 0x720   :  { %2295 = vsyncpa [#allocation6], 1 }
 0x721   :  { %2297 = vsyncpa [#allocation6 + $0x1], 1 }
 0x722   :  { %2298 = vsyncpa [#allocation9], 1 }
 0x723   :  { %2299 = vsyncpa [#allocation12], 1 }
 0x724   :  { %2300 = vsyncpa [#allocation15], 1 }
 0x725   :  { %2301 = vsyncpa [#allocation4], 1 }
 0x726   :  { %2303 = vsyncpa [#allocation4 + $0x1], 1 }

</bundles_post_ra>
